<compile_context>
chip_gen: v6e
topology: v6e:2x2x1
jax: 0.10.0
libtpu: 0.0.40
codegen_flags: <defaults>
</compile_context>

<pallas_src>
import functools

import jax
import jax.numpy as jnp
from jax import lax
from jax.experimental import pallas as pl
from jax.experimental.pallas import tpu as pltpu  # noqa: F401

_BN_EPS = 1e-5


def _round_up(x, m):
    return (x + m - 1) // m * m


# ----------------------------------------------------------------------------
# Kernels — one fused pallas_call per stage, whole arrays resident in VMEM
# ----------------------------------------------------------------------------
def _latent_kernel(z_ref, w_ref, g_ref, b_ref, o_ref, *, inv_b):
    """Linear (bias cancelled by BN) + BatchNorm1d (batch stats) + ReLU.

    z: (Bp, z_dim) f32 with rows >= true B zeroed, w: (z_dim, D) f32,
    g/b: (1, D) f32, o: (Bp, D) bf16.  Zero-padded rows contribute nothing to
    the sums, so dividing by the true batch size (inv_b) is exact.
    """
    y = jnp.dot(z_ref[...], w_ref[...], preferred_element_type=jnp.float32)
    mean = jnp.sum(y, axis=0, keepdims=True) * inv_b
    var = jnp.maximum(jnp.sum(y * y, axis=0, keepdims=True) * inv_b - mean * mean, 0.0)
    scale = g_ref[...] * lax.rsqrt(var + _BN_EPS)
    shift = b_ref[...] - mean * scale
    o_ref[...] = jnp.maximum(y * scale + shift, 0.0).astype(o_ref.dtype)


def _conv_stage_kernel(p_ref, w_ref, g_ref, b_ref, o_ref, *, cout, inv_m):
    """Fused ConvTranspose2d(4,2,1) stage: phase-stacked matmul + BN2d + ReLU.

    p: (9*Cin, Mp) bf16 tap stack, w: (4*Cout, 9*Cin) bf16 phase-stacked weight,
    g/b: (Cout, 1) f32, o: (4*Cout, Mp) bf16, phase-major rows.
    inv_m = 1/(B*OH*OW); zero-padded columns of p do not perturb the statistics.
    """
    y = jnp.dot(w_ref[...], p_ref[...], preferred_element_type=jnp.float32)  # (4C, Mp) f32
    s = jnp.sum(y, axis=1, keepdims=True)             # per-(phase,channel) sums
    q = jnp.sum(y * y, axis=1, keepdims=True)
    s_c = s[0:cout] + s[cout:2 * cout] + s[2 * cout:3 * cout] + s[3 * cout:4 * cout]
    q_c = q[0:cout] + q[cout:2 * cout] + q[2 * cout:3 * cout] + q[3 * cout:4 * cout]
    mean = s_c * inv_m
    var = jnp.maximum(q_c * inv_m - mean * mean, 0.0)  # biased var, clamped (one-pass)
    scale = g_ref[...] * lax.rsqrt(var + _BN_EPS)      # (Cout, 1)
    shift = b_ref[...] - mean * scale
    for p in range(4):                                 # per-phase affine + ReLU
        blk = y[p * cout:(p + 1) * cout]
        o_ref[p * cout:(p + 1) * cout, :] = jnp.maximum(
            blk * scale + shift, 0.0).astype(o_ref.dtype)


def _conv_final_kernel(p_ref, w_ref, g_ref, b_ref, w4_ref, o_ref, *, cout, ic, inv_m):
    """Last conv stage, additionally fused with the final 1x1 conv + tanh.

    w4: (img_channel, Cout) bf16; o: (4*img_channel, Mp) f32, phase-major rows.
    """
    y = jnp.dot(w_ref[...], p_ref[...], preferred_element_type=jnp.float32)
    s = jnp.sum(y, axis=1, keepdims=True)
    q = jnp.sum(y * y, axis=1, keepdims=True)
    s_c = s[0:cout] + s[cout:2 * cout] + s[2 * cout:3 * cout] + s[3 * cout:4 * cout]
    q_c = q[0:cout] + q[cout:2 * cout] + q[2 * cout:3 * cout] + q[3 * cout:4 * cout]
    mean = s_c * inv_m
    var = jnp.maximum(q_c * inv_m - mean * mean, 0.0)
    scale = g_ref[...] * lax.rsqrt(var + _BN_EPS)
    shift = b_ref[...] - mean * scale
    w4 = w4_ref[...]
    for p in range(4):
        h = jnp.maximum(y[p * cout:(p + 1) * cout] * scale + shift, 0.0).astype(jnp.bfloat16)
        o_ref[p * ic:(p + 1) * ic, :] = jnp.tanh(
            jnp.dot(w4, h, preferred_element_type=jnp.float32))


# ----------------------------------------------------------------------------
# pallas_call wrappers (whole-array VMEM blocks; no grid — stages are tiny)
# ----------------------------------------------------------------------------
def _latent_call(zp, w_lin_t, gamma, beta, b_true):
    Bp = zp.shape[0]
    D = w_lin_t.shape[1]
    return pl.pallas_call(
        functools.partial(_latent_kernel, inv_b=1.0 / b_true),
        out_shape=jax.ShapeDtypeStruct((Bp, D), jnp.bfloat16),
    )(zp, w_lin_t, gamma, beta)


def _conv_stage(P, w_mat, gamma, beta, cout, inv_m):
    Mp = P.shape[1]
    return pl.pallas_call(
        functools.partial(_conv_stage_kernel, cout=cout, inv_m=inv_m),
        out_shape=jax.ShapeDtypeStruct((4 * cout, Mp), jnp.bfloat16),
    )(P, w_mat, gamma, beta)


def _conv_final(P, w_mat, gamma, beta, w4, cout, ic, inv_m):
    Mp = P.shape[1]
    return pl.pallas_call(
        functools.partial(_conv_final_kernel, cout=cout, ic=ic, inv_m=inv_m),
        out_shape=jax.ShapeDtypeStruct((4 * ic, Mp), jnp.float32),
    )(P, w_mat, gamma, beta, w4)


# ----------------------------------------------------------------------------
# Layout plumbing (pure XLA, fused under jit): stride-2 phase decomposition
# ----------------------------------------------------------------------------
def _build_taps9(a):
    """a: (C, N, H, W) -> (P, M, Mp).  P (9*C, Mp) bf16 is the 9-tap stack of the
    1-padded input (the 4 output phases of ConvTranspose2d(4,2,1) each use a 2x2
    subset of these taps); M = N*H*W true positions, Mp = round_up(M, 128) with
    zero-padded columns (exact for batch statistics)."""
    C, N, H, W = a.shape
    M = N * H * W
    xp = jnp.pad(a, ((0, 0), (0, 0), (1, 1), (1, 1)))
    taps = [xp[:, :, dy:dy + H, dx:dx + W].reshape(C, M)
            for dy in range(3) for dx in range(3)]
    P = jnp.concatenate(taps, axis=0).astype(jnp.bfloat16)
    Mp = _round_up(M, 128)
    if Mp != M:
        P = jnp.pad(P, ((0, 0), (0, Mp - M)))
    return P, M, Mp


def _deinterleave(y, cout, N, H, W):
    """(4*Cout, N*H*W) phase-major -> (Cout, N, 2H, 2W)."""
    y6 = y.reshape(2, 2, cout, N, H, W)                 # (ph, pw, co, n, bh, bw)
    return jnp.transpose(y6, (2, 3, 4, 0, 5, 1)).reshape(cout, N, 2 * H, 2 * W)


# ----------------------------------------------------------------------------
# Parameters
# ----------------------------------------------------------------------------
def init_raw_params(key, z_dim, img_channel, nf):
    """Parameters in the PyTorch module's native layouts / init scheme."""
    ks = jax.random.split(key, 5)
    D = 8 * nf * 4 * 4

    def kaiming_convT(k_, cin, cout, ksz):
        # kaiming_normal_(mode='fan_out') on ConvTranspose2d weight (cin, cout, k, k)
        std = (2.0 / (cin * ksz * ksz)) ** 0.5
        return std * jax.random.normal(k_, (cin, cout, ksz, ksz), jnp.float32)

    return {
        "w_lin": 0.01 * jax.random.normal(ks[0], (D, z_dim), jnp.float32),   # (out, in)
        "b_lin": jnp.zeros((D,), jnp.float32),   # cancelled exactly by BatchNorm1d
        "bn0_g": jnp.ones((D,), jnp.float32), "bn0_b": jnp.zeros((D,), jnp.float32),
        "w1": kaiming_convT(ks[1], 8 * nf, 4 * nf, 4),
        "bn1_g": jnp.ones((4 * nf,), jnp.float32), "bn1_b": jnp.zeros((4 * nf,), jnp.float32),
        "w2": kaiming_convT(ks[2], 4 * nf, 2 * nf, 4),
        "bn2_g": jnp.ones((2 * nf,), jnp.float32), "bn2_b": jnp.zeros((2 * nf,), jnp.float32),
        "w3": kaiming_convT(ks[3], 2 * nf, nf, 4),
        "bn3_g": jnp.ones((nf,), jnp.float32), "bn3_b": jnp.zeros((nf,), jnp.float32),
        "w4": kaiming_convT(ks[4], nf, img_channel, 1),
    }


def _convT_to_phase_mat(w):
    """(Cin, Cout, 4, 4) ConvTranspose2d weight -> (4*Cout, 9*Cin) phase-stacked
    matmul weight for the stride-2 decomposition.  Output phase p = 2*ph + pw
    (row block), tap t = 3*dy + dx (column block) holds w[ci, co, kh, kw] with
    kh = 3 + ph - 2*dy, kw = 3 + pw - 2*dx (zero where out of kernel range)."""
    cin, cout, k, _ = w.shape
    wm = jnp.zeros((4 * cout, 9 * cin), jnp.float32)
    for ph in range(2):
        for pw in range(2):
            p = 2 * ph + pw
            for dy in range(3):
                kh = 3 + ph - 2 * dy
                if not 0 <= kh < k:
                    continue
                for dx in range(3):
                    kw = 3 + pw - 2 * dx
                    if not 0 <= kw < k:
                        continue
                    t = 3 * dy + dx
                    wm = wm.at[p * cout:(p + 1) * cout,
                               t * cin:(t + 1) * cin].set(w[:, :, kh, kw].T)
    return wm


def prepare_params(raw):
    """One-time layout transforms, kept out of the per-call jitted forward."""
    D = raw["w_lin"].shape[0]
    return {
        # latent stays f32: tiny matmul, tiny-batch BN1d statistics are precision sensitive
        "w_lin_t": raw["w_lin"].T,                                # (z_dim, D)
        "bn0_g": raw["bn0_g"].reshape(1, D),
        "bn0_b": raw["bn0_b"].reshape(1, D),
        # conv matmul weights in bf16 (MXU-native); f32 accumulation in the kernels
        "w1m": _convT_to_phase_mat(raw["w1"]).astype(jnp.bfloat16),
        "w2m": _convT_to_phase_mat(raw["w2"]).astype(jnp.bfloat16),
        "w3m": _convT_to_phase_mat(raw["w3"]).astype(jnp.bfloat16),
        "w4m": raw["w4"][:, :, 0, 0].T.astype(jnp.bfloat16),      # (img_channel, nf)
        "bn1_g": raw["bn1_g"].reshape(-1, 1), "bn1_b": raw["bn1_b"].reshape(-1, 1),
        "bn2_g": raw["bn2_g"].reshape(-1, 1), "bn2_b": raw["bn2_b"].reshape(-1, 1),
        "bn3_g": raw["bn3_g"].reshape(-1, 1), "bn3_b": raw["bn3_b"].reshape(-1, 1),
    }


# ----------------------------------------------------------------------------
# Generator forward
# ----------------------------------------------------------------------------
@functools.partial(jax.jit, static_argnames=("nf", "img_channel"))
def generator_forward(params, z, *, nf, img_channel):
    B = z.shape[0]

    # ---- latent: Linear + BatchNorm1d + ReLU (one fused kernel)
    Bp = _round_up(B, 8)
    zp = jnp.zeros((Bp, z.shape[1]), jnp.float32).at[:B].set(z)
    lat = _latent_call(zp, params["w_lin_t"], params["bn0_g"], params["bn0_b"], B)
    a = lat[:B].reshape(B, 8 * nf, 4, 4).transpose(1, 0, 2, 3)    # (C, N, 4, 4) bf16

    # ---- ConvTranspose(8nf -> 4nf, 4, 2, 1) + BN + ReLU          4x4 -> 8x8
    _, N, H, W = a.shape
    P, M, _ = _build_taps9(a)
    y = _conv_stage(P, params["w1m"], params["bn1_g"], params["bn1_b"], 4 * nf, 1.0 / (4 * M))
    a = _deinterleave(y[:, :M], 4 * nf, N, H, W)

    # ---- ConvTranspose(4nf -> 2nf, 4, 2, 1) + BN + ReLU          8x8 -> 16x16
    _, N, H, W = a.shape
    P, M, _ = _build_taps9(a)
    y = _conv_stage(P, params["w2m"], params["bn2_g"], params["bn2_b"], 2 * nf, 1.0 / (4 * M))
    a = _deinterleave(y[:, :M], 2 * nf, N, H, W)

    # ---- ConvTranspose(2nf -> nf, 4, 2, 1) + BN + ReLU + 1x1 conv + tanh   16x16 -> 32x32
    _, N, H, W = a.shape
    P, M, _ = _build_taps9(a)
    o = _conv_final(P, params["w3m"], params["bn3_g"], params["bn3_b"], params["w4m"],
                    nf, img_channel, 1.0 / (4 * M))
    o6 = o[:, :M].reshape(2, 2, img_channel, N, H, W)              # (ph, pw, oc, n, bh, bw)
    img = jnp.transpose(o6, (3, 2, 4, 0, 5, 1)).reshape(N, img_channel, 2 * H, 2 * W)
    return img.astype(jnp.float32)                                 # (B, img_channel, 32, 32)


# ----------------------------------------------------------------------------
# Pure-XLA f32 reference (mirrors the PyTorch module, training-mode BatchNorm)
# ----------------------------------------------------------------------------
def _ref_forward(raw, z, nf, img_channel):
    B = z.shape[0]
    y = z @ raw["w_lin"].T + raw["b_lin"]
    m = jnp.mean(y, 0, keepdims=True)
    v = jnp.mean((y - m) ** 2, 0, keepdims=True)
    y = jnp.maximum((y - m) * lax.rsqrt(v + _BN_EPS) * raw["bn0_g"] + raw["bn0_b"], 0.0)
    x = y.reshape(B, 8 * nf, 4, 4)

    def convT(x, w):               # ConvTranspose2d(4, 2, 1, bias=False), w: (Cin, Cout, 4, 4)
        wr = jnp.flip(w, (2, 3)).transpose(1, 0, 2, 3)             # OIHW
        return lax.conv_general_dilated(x, wr, window_strides=(1, 1),
                                        padding=((2, 2), (2, 2)), lhs_dilation=(2, 2),
                                        dimension_numbers=("NCHW", "OIHW", "NCHW"))

    def bn2d(x, g, b):
        m = jnp.mean(x, (0, 2, 3), keepdims=True)
        v = jnp.mean((x - m) ** 2, (0, 2, 3), keepdims=True)
        return (x - m) * lax.rsqrt(v + _BN_EPS) * g.reshape(1, -1, 1, 1) + b.reshape(1, -1, 1, 1)

    for wk, gk, bk in (("w1", "bn1_g", "bn1_b"), ("w2", "bn2_g", "bn2_b"), ("w3", "bn3_g", "bn3_b")):
        x = jnp.maximum(bn2d(convT(x, raw[wk]), raw[gk], raw[bk]), 0.0)

    out = jnp.einsum("nihw,io->nohw", x, raw["w4"][:, :, 0, 0])
    return jnp.tanh(out)


if __name__ == "__main__":
    B, Z_DIM, NF, IMG_C = 2, 32, 8, 3

    key = jax.random.PRNGKey(0)
    k_param, k_z = jax.random.split(key)
    raw = init_raw_params(k_param, Z_DIM, IMG_C, NF)
    params = prepare_params(raw)
    z = jax.random.normal(k_z, (B, Z_DIM), jnp.float32)

    out = generator_forward(params, z, nf=NF, img_channel=IMG_C)
    out = jax.block_until_ready(out)

    assert out.shape == (B, IMG_C, 32, 32), out.shape
    assert bool(jnp.all(jnp.isfinite(out)))
    assert bool(jnp.all(jnp.abs(out) <= 1.0 + 1e-6))               # tanh range

    # compare against the pure-XLA f32 reference (bf16 conv path -> loose tolerance)
    ref = jax.block_until_ready(_ref_forward(raw, z, NF, IMG_C))
    max_err = float(jnp.max(jnp.abs(out - ref)))
    corr = float(jnp.corrcoef(out.ravel(), ref.ravel())[0, 1])
    assert max_err < 0.3 and corr > 0.98, (max_err, corr)
    print("KERNEL_OK")
</pallas_src>

<mosaic_0001>
module attributes {stable_mosaic.version = 11 : i64} {
  func.func @_latent_kernel(%arg0: memref<8x32xf32, #tpu.memory_space<vmem>>, %arg1: memref<32x1024xf32, #tpu.memory_space<vmem>>, %arg2: memref<1x1024xf32, #tpu.memory_space<vmem>>, %arg3: memref<1x1024xf32, #tpu.memory_space<vmem>>, %arg4: memref<8x1024xbf16, #tpu.memory_space<vmem>>) attributes {dimension_semantics = [], scalar_prefetch = 0 : i64, scratch_operands = 0 : i64, tpu.core_type = #tpu.core_type<tc>} {
    %c0 = arith.constant 0 : index
    %c0_0 = arith.constant 0 : index
    %0 = vector.load %arg0[%c0, %c0_0] : memref<8x32xf32, #tpu.memory_space<vmem>>, vector<8x32xf32>
    %c0_1 = arith.constant 0 : index
    %c0_2 = arith.constant 0 : index
    %1 = vector.load %arg1[%c0_1, %c0_2] : memref<32x1024xf32, #tpu.memory_space<vmem>>, vector<32x1024xf32>
    %cst = arith.constant dense<0.000000e+00> : vector<8x1024xf32>
    %2 = tpu.matmul %0, %1, %cst {dimension_numbers = #tpu.dot_dimension_numbers<[1], [0], [0], [1], [0, 0, 1, 1], [], []>} : vector<8x32xf32>, vector<32x1024xf32>, vector<8x1024xf32> -> vector<8x1024xf32>
    %cst_3 = arith.constant dense<0.000000e+00> : vector<1024xf32>
    %3 = vector.multi_reduction <add>, %2, %cst_3 [0] : vector<8x1024xf32> to vector<1024xf32>
    %4 = vector.shape_cast %3 : vector<1024xf32> to vector<1x1024xf32>
    %cst_4 = arith.constant 5.000000e-01 : f32
    %5 = vector.broadcast %cst_4 : f32 to vector<1x1024xf32>
    %6 = arith.mulf %4, %5 : vector<1x1024xf32>
    %7 = arith.mulf %2, %2 : vector<8x1024xf32>
    %cst_5 = arith.constant dense<0.000000e+00> : vector<1024xf32>
    %8 = vector.multi_reduction <add>, %7, %cst_5 [0] : vector<8x1024xf32> to vector<1024xf32>
    %9 = vector.shape_cast %8 : vector<1024xf32> to vector<1x1024xf32>
    %cst_6 = arith.constant 5.000000e-01 : f32
    %10 = vector.broadcast %cst_6 : f32 to vector<1x1024xf32>
    %11 = arith.mulf %9, %10 : vector<1x1024xf32>
    %12 = arith.mulf %6, %6 : vector<1x1024xf32>
    %13 = arith.subf %11, %12 : vector<1x1024xf32>
    %cst_7 = arith.constant 0.000000e+00 : f32
    %14 = vector.broadcast %cst_7 : f32 to vector<1x1024xf32>
    %15 = arith.maximumf %13, %14 : vector<1x1024xf32>
    %c0_8 = arith.constant 0 : index
    %c0_9 = arith.constant 0 : index
    %16 = vector.load %arg2[%c0_8, %c0_9] : memref<1x1024xf32, #tpu.memory_space<vmem>>, vector<1x1024xf32>
    %cst_10 = arith.constant 9.99999974E-6 : f32
    %17 = vector.broadcast %cst_10 : f32 to vector<1x1024xf32>
    %18 = arith.addf %15, %17 : vector<1x1024xf32>
    %19 = math.rsqrt %18 : vector<1x1024xf32>
    %20 = arith.mulf %16, %19 : vector<1x1024xf32>
    %c0_11 = arith.constant 0 : index
    %c0_12 = arith.constant 0 : index
    %21 = vector.load %arg3[%c0_11, %c0_12] : memref<1x1024xf32, #tpu.memory_space<vmem>>, vector<1x1024xf32>
    %22 = arith.mulf %6, %20 : vector<1x1024xf32>
    %23 = arith.subf %21, %22 : vector<1x1024xf32>
    %24 = vector.broadcast %20 : vector<1x1024xf32> to vector<8x1024xf32>
    %25 = arith.mulf %2, %24 : vector<8x1024xf32>
    %26 = vector.broadcast %23 : vector<1x1024xf32> to vector<8x1024xf32>
    %27 = arith.addf %25, %26 : vector<8x1024xf32>
    %cst_13 = arith.constant 0.000000e+00 : f32
    %28 = vector.broadcast %cst_13 : f32 to vector<8x1024xf32>
    %29 = arith.maximumf %27, %28 : vector<8x1024xf32>
    %30 = arith.truncf %29 : vector<8x1024xf32> to vector<8x1024xbf16>
    %c0_14 = arith.constant 0 : index
    %c0_15 = arith.constant 0 : index
    %31 = vector.load %arg4[%c0_14, %c0_15] : memref<8x1024xbf16, #tpu.memory_space<vmem>>, vector<8x1024xbf16>
    tpu.vector_store %arg4[%c0_14, %c0_15], %30 {strides = array<i32>} : memref<8x1024xbf16, #tpu.memory_space<vmem>>, vector<8x1024xbf16>,
    return
  }
}

module attributes {stable_mosaic.version = 11 : i64} {
  func.func @_conv_stage_kernel(%arg0: memref<576x128xbf16, #tpu.memory_space<vmem>>, %arg1: memref<128x576xbf16, #tpu.memory_space<vmem>>, %arg2: memref<32x1xf32, #tpu.memory_space<vmem>>, %arg3: memref<32x1xf32, #tpu.memory_space<vmem>>, %arg4: memref<128x128xbf16, #tpu.memory_space<vmem>>) attributes {dimension_semantics = [], scalar_prefetch = 0 : i64, scratch_operands = 0 : i64, tpu.core_type = #tpu.core_type<tc>} {
    %c0 = arith.constant 0 : index
    %c0_0 = arith.constant 0 : index
    %0 = vector.load %arg1[%c0, %c0_0] : memref<128x576xbf16, #tpu.memory_space<vmem>>, vector<128x576xbf16>
    %c0_1 = arith.constant 0 : index
    %c0_2 = arith.constant 0 : index
    %1 = vector.load %arg0[%c0_1, %c0_2] : memref<576x128xbf16, #tpu.memory_space<vmem>>, vector<576x128xbf16>
    %cst = arith.constant dense<0.000000e+00> : vector<128x128xf32>
    %2 = tpu.matmul %0, %1, %cst {dimension_numbers = #tpu.dot_dimension_numbers<[1], [0], [0], [1], [0, 0, 1, 1], [], []>} : vector<128x576xbf16>, vector<576x128xbf16>, vector<128x128xf32> -> vector<128x128xf32>
    %cst_3 = arith.constant dense<0.000000e+00> : vector<128xf32>
    %3 = vector.multi_reduction <add>, %2, %cst_3 [1] : vector<128x128xf32> to vector<128xf32>
    %4 = vector.shape_cast %3 : vector<128xf32> to vector<128x1xf32>
    %5 = arith.mulf %2, %2 : vector<128x128xf32>
    %cst_4 = arith.constant dense<0.000000e+00> : vector<128xf32>
    %6 = vector.multi_reduction <add>, %5, %cst_4 [1] : vector<128x128xf32> to vector<128xf32>
    %7 = vector.shape_cast %6 : vector<128xf32> to vector<128x1xf32>
    %8 = vector.extract_strided_slice %4 {offsets = [0, 0], sizes = [32, 1], strides = [1, 1]} : vector<128x1xf32> to vector<32x1xf32>
    %9 = vector.extract_strided_slice %4 {offsets = [32, 0], sizes = [32, 1], strides = [1, 1]} : vector<128x1xf32> to vector<32x1xf32>
    %10 = arith.addf %8, %9 : vector<32x1xf32>
    %11 = vector.extract_strided_slice %4 {offsets = [64, 0], sizes = [32, 1], strides = [1, 1]} : vector<128x1xf32> to vector<32x1xf32>
    %12 = arith.addf %10, %11 : vector<32x1xf32>
    %13 = vector.extract_strided_slice %4 {offsets = [96, 0], sizes = [32, 1], strides = [1, 1]} : vector<128x1xf32> to vector<32x1xf32>
    %14 = arith.addf %12, %13 : vector<32x1xf32>
    %15 = vector.extract_strided_slice %7 {offsets = [0, 0], sizes = [32, 1], strides = [1, 1]} : vector<128x1xf32> to vector<32x1xf32>
    %16 = vector.extract_strided_slice %7 {offsets = [32, 0], sizes = [32, 1], strides = [1, 1]} : vector<128x1xf32> to vector<32x1xf32>
    %17 = arith.addf %15, %16 : vector<32x1xf32>
    %18 = vector.extract_strided_slice %7 {offsets = [64, 0], sizes = [32, 1], strides = [1, 1]} : vector<128x1xf32> to vector<32x1xf32>
    %19 = arith.addf %17, %18 : vector<32x1xf32>
    %20 = vector.extract_strided_slice %7 {offsets = [96, 0], sizes = [32, 1], strides = [1, 1]} : vector<128x1xf32> to vector<32x1xf32>
    %21 = arith.addf %19, %20 : vector<32x1xf32>
    %cst_5 = arith.constant 7.812500e-03 : f32
    %22 = vector.broadcast %cst_5 : f32 to vector<32x1xf32>
    %23 = arith.mulf %14, %22 : vector<32x1xf32>
    %cst_6 = arith.constant 7.812500e-03 : f32
    %24 = vector.broadcast %cst_6 : f32 to vector<32x1xf32>
    %25 = arith.mulf %21, %24 : vector<32x1xf32>
    %26 = arith.mulf %23, %23 : vector<32x1xf32>
    %27 = arith.subf %25, %26 : vector<32x1xf32>
    %cst_7 = arith.constant 0.000000e+00 : f32
    %28 = vector.broadcast %cst_7 : f32 to vector<32x1xf32>
    %29 = arith.maximumf %27, %28 : vector<32x1xf32>
    %c0_8 = arith.constant 0 : index
    %c0_9 = arith.constant 0 : index
    %30 = vector.load %arg2[%c0_8, %c0_9] : memref<32x1xf32, #tpu.memory_space<vmem>>, vector<32x1xf32>
    %cst_10 = arith.constant 9.99999974E-6 : f32
    %31 = vector.broadcast %cst_10 : f32 to vector<32x1xf32>
    %32 = arith.addf %29, %31 : vector<32x1xf32>
    %33 = math.rsqrt %32 : vector<32x1xf32>
    %34 = arith.mulf %30, %33 : vector<32x1xf32>
    %c0_11 = arith.constant 0 : index
    %c0_12 = arith.constant 0 : index
    %35 = vector.load %arg3[%c0_11, %c0_12] : memref<32x1xf32, #tpu.memory_space<vmem>>, vector<32x1xf32>
    %36 = arith.mulf %23, %34 : vector<32x1xf32>
    %37 = arith.subf %35, %36 : vector<32x1xf32>
    %38 = vector.extract_strided_slice %2 {offsets = [0, 0], sizes = [32, 128], strides = [1, 1]} : vector<128x128xf32> to vector<32x128xf32>
    %39 = vector.broadcast %34 : vector<32x1xf32> to vector<32x128xf32>
    %40 = arith.mulf %38, %39 : vector<32x128xf32>
    %41 = vector.broadcast %37 : vector<32x1xf32> to vector<32x128xf32>
    %42 = arith.addf %40, %41 : vector<32x128xf32>
    %cst_13 = arith.constant 0.000000e+00 : f32
    %43 = vector.broadcast %cst_13 : f32 to vector<32x128xf32>
    %44 = arith.maximumf %42, %43 : vector<32x128xf32>
    %45 = arith.truncf %44 : vector<32x128xf32> to vector<32x128xbf16>
    %c0_14 = arith.constant 0 : index
    %c0_15 = arith.constant 0 : index
    %46 = vector.load %arg4[%c0_14, %c0_15] : memref<128x128xbf16, #tpu.memory_space<vmem>>, vector<32x128xbf16>
    tpu.vector_store %arg4[%c0_14, %c0_15], %45 {strides = array<i32>} : memref<128x128xbf16, #tpu.memory_space<vmem>>, vector<32x128xbf16>,
    %47 = vector.extract_strided_slice %2 {offsets = [32, 0], sizes = [32, 128], strides = [1, 1]} : vector<128x128xf32> to vector<32x128xf32>
    %48 = vector.broadcast %34 : vector<32x1xf32> to vector<32x128xf32>
    %49 = arith.mulf %47, %48 : vector<32x128xf32>
    %50 = vector.broadcast %37 : vector<32x1xf32> to vector<32x128xf32>
    %51 = arith.addf %49, %50 : vector<32x128xf32>
    %cst_16 = arith.constant 0.000000e+00 : f32
    %52 = vector.broadcast %cst_16 : f32 to vector<32x128xf32>
    %53 = arith.maximumf %51, %52 : vector<32x128xf32>
    %54 = arith.truncf %53 : vector<32x128xf32> to vector<32x128xbf16>
    %c32 = arith.constant 32 : index
    %c0_17 = arith.constant 0 : index
    %55 = vector.load %arg4[%c32, %c0_17] : memref<128x128xbf16, #tpu.memory_space<vmem>>, vector<32x128xbf16>
    tpu.vector_store %arg4[%c32, %c0_17], %54 {strides = array<i32>} : memref<128x128xbf16, #tpu.memory_space<vmem>>, vector<32x128xbf16>,
    %56 = vector.extract_strided_slice %2 {offsets = [64, 0], sizes = [32, 128], strides = [1, 1]} : vector<128x128xf32> to vector<32x128xf32>
    %57 = vector.broadcast %34 : vector<32x1xf32> to vector<32x128xf32>
    %58 = arith.mulf %56, %57 : vector<32x128xf32>
    %59 = vector.broadcast %37 : vector<32x1xf32> to vector<32x128xf32>
    %60 = arith.addf %58, %59 : vector<32x128xf32>
    %cst_18 = arith.constant 0.000000e+00 : f32
    %61 = vector.broadcast %cst_18 : f32 to vector<32x128xf32>
    %62 = arith.maximumf %60, %61 : vector<32x128xf32>
    %63 = arith.truncf %62 : vector<32x128xf32> to vector<32x128xbf16>
    %c64 = arith.constant 64 : index
    %c0_19 = arith.constant 0 : index
    %64 = vector.load %arg4[%c64, %c0_19] : memref<128x128xbf16, #tpu.memory_space<vmem>>, vector<32x128xbf16>
    tpu.vector_store %arg4[%c64, %c0_19], %63 {strides = array<i32>} : memref<128x128xbf16, #tpu.memory_space<vmem>>, vector<32x128xbf16>,
    %65 = vector.extract_strided_slice %2 {offsets = [96, 0], sizes = [32, 128], strides = [1, 1]} : vector<128x128xf32> to vector<32x128xf32>
    %66 = vector.broadcast %34 : vector<32x1xf32> to vector<32x128xf32>
    %67 = arith.mulf %65, %66 : vector<32x128xf32>
    %68 = vector.broadcast %37 : vector<32x1xf32> to vector<32x128xf32>
    %69 = arith.addf %67, %68 : vector<32x128xf32>
    %cst_20 = arith.constant 0.000000e+00 : f32
    %70 = vector.broadcast %cst_20 : f32 to vector<32x128xf32>
    %71 = arith.maximumf %69, %70 : vector<32x128xf32>
    %72 = arith.truncf %71 : vector<32x128xf32> to vector<32x128xbf16>
    %c96 = arith.constant 96 : index
    %c0_21 = arith.constant 0 : index
    %73 = vector.load %arg4[%c96, %c0_21] : memref<128x128xbf16, #tpu.memory_space<vmem>>, vector<32x128xbf16>
    tpu.vector_store %arg4[%c96, %c0_21], %72 {strides = array<i32>} : memref<128x128xbf16, #tpu.memory_space<vmem>>, vector<32x128xbf16>,
    return
  }
}

module attributes {stable_mosaic.version = 11 : i64} {
  func.func @_conv_stage_kernel(%arg0: memref<288x128xbf16, #tpu.memory_space<vmem>>, %arg1: memref<64x288xbf16, #tpu.memory_space<vmem>>, %arg2: memref<16x1xf32, #tpu.memory_space<vmem>>, %arg3: memref<16x1xf32, #tpu.memory_space<vmem>>, %arg4: memref<64x128xbf16, #tpu.memory_space<vmem>>) attributes {dimension_semantics = [], scalar_prefetch = 0 : i64, scratch_operands = 0 : i64, tpu.core_type = #tpu.core_type<tc>} {
    %c0 = arith.constant 0 : index
    %c0_0 = arith.constant 0 : index
    %0 = vector.load %arg1[%c0, %c0_0] : memref<64x288xbf16, #tpu.memory_space<vmem>>, vector<64x288xbf16>
    %c0_1 = arith.constant 0 : index
    %c0_2 = arith.constant 0 : index
    %1 = vector.load %arg0[%c0_1, %c0_2] : memref<288x128xbf16, #tpu.memory_space<vmem>>, vector<288x128xbf16>
    %cst = arith.constant dense<0.000000e+00> : vector<64x128xf32>
    %2 = tpu.matmul %0, %1, %cst {dimension_numbers = #tpu.dot_dimension_numbers<[1], [0], [0], [1], [0, 0, 1, 1], [], []>} : vector<64x288xbf16>, vector<288x128xbf16>, vector<64x128xf32> -> vector<64x128xf32>
    %cst_3 = arith.constant dense<0.000000e+00> : vector<64xf32>
    %3 = vector.multi_reduction <add>, %2, %cst_3 [1] : vector<64x128xf32> to vector<64xf32>
    %4 = vector.shape_cast %3 : vector<64xf32> to vector<64x1xf32>
    %5 = arith.mulf %2, %2 : vector<64x128xf32>
    %cst_4 = arith.constant dense<0.000000e+00> : vector<64xf32>
    %6 = vector.multi_reduction <add>, %5, %cst_4 [1] : vector<64x128xf32> to vector<64xf32>
    %7 = vector.shape_cast %6 : vector<64xf32> to vector<64x1xf32>
    %8 = vector.extract_strided_slice %4 {offsets = [0, 0], sizes = [16, 1], strides = [1, 1]} : vector<64x1xf32> to vector<16x1xf32>
    %9 = vector.extract_strided_slice %4 {offsets = [16, 0], sizes = [16, 1], strides = [1, 1]} : vector<64x1xf32> to vector<16x1xf32>
    %10 = arith.addf %8, %9 : vector<16x1xf32>
    %11 = vector.extract_strided_slice %4 {offsets = [32, 0], sizes = [16, 1], strides = [1, 1]} : vector<64x1xf32> to vector<16x1xf32>
    %12 = arith.addf %10, %11 : vector<16x1xf32>
    %13 = vector.extract_strided_slice %4 {offsets = [48, 0], sizes = [16, 1], strides = [1, 1]} : vector<64x1xf32> to vector<16x1xf32>
    %14 = arith.addf %12, %13 : vector<16x1xf32>
    %15 = vector.extract_strided_slice %7 {offsets = [0, 0], sizes = [16, 1], strides = [1, 1]} : vector<64x1xf32> to vector<16x1xf32>
    %16 = vector.extract_strided_slice %7 {offsets = [16, 0], sizes = [16, 1], strides = [1, 1]} : vector<64x1xf32> to vector<16x1xf32>
    %17 = arith.addf %15, %16 : vector<16x1xf32>
    %18 = vector.extract_strided_slice %7 {offsets = [32, 0], sizes = [16, 1], strides = [1, 1]} : vector<64x1xf32> to vector<16x1xf32>
    %19 = arith.addf %17, %18 : vector<16x1xf32>
    %20 = vector.extract_strided_slice %7 {offsets = [48, 0], sizes = [16, 1], strides = [1, 1]} : vector<64x1xf32> to vector<16x1xf32>
    %21 = arith.addf %19, %20 : vector<16x1xf32>
    %cst_5 = arith.constant 0.001953125 : f32
    %22 = vector.broadcast %cst_5 : f32 to vector<16x1xf32>
    %23 = arith.mulf %14, %22 : vector<16x1xf32>
    %cst_6 = arith.constant 0.001953125 : f32
    %24 = vector.broadcast %cst_6 : f32 to vector<16x1xf32>
    %25 = arith.mulf %21, %24 : vector<16x1xf32>
    %26 = arith.mulf %23, %23 : vector<16x1xf32>
    %27 = arith.subf %25, %26 : vector<16x1xf32>
    %cst_7 = arith.constant 0.000000e+00 : f32
    %28 = vector.broadcast %cst_7 : f32 to vector<16x1xf32>
    %29 = arith.maximumf %27, %28 : vector<16x1xf32>
    %c0_8 = arith.constant 0 : index
    %c0_9 = arith.constant 0 : index
    %30 = vector.load %arg2[%c0_8, %c0_9] : memref<16x1xf32, #tpu.memory_space<vmem>>, vector<16x1xf32>
    %cst_10 = arith.constant 9.99999974E-6 : f32
    %31 = vector.broadcast %cst_10 : f32 to vector<16x1xf32>
    %32 = arith.addf %29, %31 : vector<16x1xf32>
    %33 = math.rsqrt %32 : vector<16x1xf32>
    %34 = arith.mulf %30, %33 : vector<16x1xf32>
    %c0_11 = arith.constant 0 : index
    %c0_12 = arith.constant 0 : index
    %35 = vector.load %arg3[%c0_11, %c0_12] : memref<16x1xf32, #tpu.memory_space<vmem>>, vector<16x1xf32>
    %36 = arith.mulf %23, %34 : vector<16x1xf32>
    %37 = arith.subf %35, %36 : vector<16x1xf32>
    %38 = vector.extract_strided_slice %2 {offsets = [0, 0], sizes = [16, 128], strides = [1, 1]} : vector<64x128xf32> to vector<16x128xf32>
    %39 = vector.broadcast %34 : vector<16x1xf32> to vector<16x128xf32>
    %40 = arith.mulf %38, %39 : vector<16x128xf32>
    %41 = vector.broadcast %37 : vector<16x1xf32> to vector<16x128xf32>
    %42 = arith.addf %40, %41 : vector<16x128xf32>
    %cst_13 = arith.constant 0.000000e+00 : f32
    %43 = vector.broadcast %cst_13 : f32 to vector<16x128xf32>
    %44 = arith.maximumf %42, %43 : vector<16x128xf32>
    %45 = arith.truncf %44 : vector<16x128xf32> to vector<16x128xbf16>
    %c0_14 = arith.constant 0 : index
    %c0_15 = arith.constant 0 : index
    %46 = vector.load %arg4[%c0_14, %c0_15] : memref<64x128xbf16, #tpu.memory_space<vmem>>, vector<16x128xbf16>
    tpu.vector_store %arg4[%c0_14, %c0_15], %45 {strides = array<i32>} : memref<64x128xbf16, #tpu.memory_space<vmem>>, vector<16x128xbf16>,
    %47 = vector.extract_strided_slice %2 {offsets = [16, 0], sizes = [16, 128], strides = [1, 1]} : vector<64x128xf32> to vector<16x128xf32>
    %48 = vector.broadcast %34 : vector<16x1xf32> to vector<16x128xf32>
    %49 = arith.mulf %47, %48 : vector<16x128xf32>
    %50 = vector.broadcast %37 : vector<16x1xf32> to vector<16x128xf32>
    %51 = arith.addf %49, %50 : vector<16x128xf32>
    %cst_16 = arith.constant 0.000000e+00 : f32
    %52 = vector.broadcast %cst_16 : f32 to vector<16x128xf32>
    %53 = arith.maximumf %51, %52 : vector<16x128xf32>
    %54 = arith.truncf %53 : vector<16x128xf32> to vector<16x128xbf16>
    %c16 = arith.constant 16 : index
    %c0_17 = arith.constant 0 : index
    %55 = vector.load %arg4[%c16, %c0_17] : memref<64x128xbf16, #tpu.memory_space<vmem>>, vector<16x128xbf16>
    tpu.vector_store %arg4[%c16, %c0_17], %54 {strides = array<i32>} : memref<64x128xbf16, #tpu.memory_space<vmem>>, vector<16x128xbf16>,
    %56 = vector.extract_strided_slice %2 {offsets = [32, 0], sizes = [16, 128], strides = [1, 1]} : vector<64x128xf32> to vector<16x128xf32>
    %57 = vector.broadcast %34 : vector<16x1xf32> to vector<16x128xf32>
    %58 = arith.mulf %56, %57 : vector<16x128xf32>
    %59 = vector.broadcast %37 : vector<16x1xf32> to vector<16x128xf32>
    %60 = arith.addf %58, %59 : vector<16x128xf32>
    %cst_18 = arith.constant 0.000000e+00 : f32
    %61 = vector.broadcast %cst_18 : f32 to vector<16x128xf32>
    %62 = arith.maximumf %60, %61 : vector<16x128xf32>
    %63 = arith.truncf %62 : vector<16x128xf32> to vector<16x128xbf16>
    %c32 = arith.constant 32 : index
    %c0_19 = arith.constant 0 : index
    %64 = vector.load %arg4[%c32, %c0_19] : memref<64x128xbf16, #tpu.memory_space<vmem>>, vector<16x128xbf16>
    tpu.vector_store %arg4[%c32, %c0_19], %63 {strides = array<i32>} : memref<64x128xbf16, #tpu.memory_space<vmem>>, vector<16x128xbf16>,
    %65 = vector.extract_strided_slice %2 {offsets = [48, 0], sizes = [16, 128], strides = [1, 1]} : vector<64x128xf32> to vector<16x128xf32>
    %66 = vector.broadcast %34 : vector<16x1xf32> to vector<16x128xf32>
    %67 = arith.mulf %65, %66 : vector<16x128xf32>
    %68 = vector.broadcast %37 : vector<16x1xf32> to vector<16x128xf32>
    %69 = arith.addf %67, %68 : vector<16x128xf32>
    %cst_20 = arith.constant 0.000000e+00 : f32
    %70 = vector.broadcast %cst_20 : f32 to vector<16x128xf32>
    %71 = arith.maximumf %69, %70 : vector<16x128xf32>
    %72 = arith.truncf %71 : vector<16x128xf32> to vector<16x128xbf16>
    %c48 = arith.constant 48 : index
    %c0_21 = arith.constant 0 : index
    %73 = vector.load %arg4[%c48, %c0_21] : memref<64x128xbf16, #tpu.memory_space<vmem>>, vector<16x128xbf16>
    tpu.vector_store %arg4[%c48, %c0_21], %72 {strides = array<i32>} : memref<64x128xbf16, #tpu.memory_space<vmem>>, vector<16x128xbf16>,
    return
  }
}

module attributes {stable_mosaic.version = 11 : i64} {
  func.func @_conv_final_kernel(%arg0: memref<144x512xbf16, #tpu.memory_space<vmem>>, %arg1: memref<32x144xbf16, #tpu.memory_space<vmem>>, %arg2: memref<8x1xf32, #tpu.memory_space<vmem>>, %arg3: memref<8x1xf32, #tpu.memory_space<vmem>>, %arg4: memref<3x8xbf16, #tpu.memory_space<vmem>>, %arg5: memref<12x512xf32, #tpu.memory_space<vmem>>) attributes {dimension_semantics = [], scalar_prefetch = 0 : i64, scratch_operands = 0 : i64, tpu.core_type = #tpu.core_type<tc>} {
    %c0 = arith.constant 0 : index
    %c0_0 = arith.constant 0 : index
    %0 = vector.load %arg1[%c0, %c0_0] : memref<32x144xbf16, #tpu.memory_space<vmem>>, vector<32x144xbf16>
    %c0_1 = arith.constant 0 : index
    %c0_2 = arith.constant 0 : index
    %1 = vector.load %arg0[%c0_1, %c0_2] : memref<144x512xbf16, #tpu.memory_space<vmem>>, vector<144x512xbf16>
    %cst = arith.constant dense<0.000000e+00> : vector<32x512xf32>
    %2 = tpu.matmul %0, %1, %cst {dimension_numbers = #tpu.dot_dimension_numbers<[1], [0], [0], [1], [0, 0, 1, 1], [], []>} : vector<32x144xbf16>, vector<144x512xbf16>, vector<32x512xf32> -> vector<32x512xf32>
    %cst_3 = arith.constant dense<0.000000e+00> : vector<32xf32>
    %3 = vector.multi_reduction <add>, %2, %cst_3 [1] : vector<32x512xf32> to vector<32xf32>
    %4 = vector.shape_cast %3 : vector<32xf32> to vector<32x1xf32>
    %5 = arith.mulf %2, %2 : vector<32x512xf32>
    %cst_4 = arith.constant dense<0.000000e+00> : vector<32xf32>
    %6 = vector.multi_reduction <add>, %5, %cst_4 [1] : vector<32x512xf32> to vector<32xf32>
    %7 = vector.shape_cast %6 : vector<32xf32> to vector<32x1xf32>
    %8 = vector.extract_strided_slice %4 {offsets = [0, 0], sizes = [8, 1], strides = [1, 1]} : vector<32x1xf32> to vector<8x1xf32>
    %9 = vector.extract_strided_slice %4 {offsets = [8, 0], sizes = [8, 1], strides = [1, 1]} : vector<32x1xf32> to vector<8x1xf32>
    %10 = arith.addf %8, %9 : vector<8x1xf32>
    %11 = vector.extract_strided_slice %4 {offsets = [16, 0], sizes = [8, 1], strides = [1, 1]} : vector<32x1xf32> to vector<8x1xf32>
    %12 = arith.addf %10, %11 : vector<8x1xf32>
    %13 = vector.extract_strided_slice %4 {offsets = [24, 0], sizes = [8, 1], strides = [1, 1]} : vector<32x1xf32> to vector<8x1xf32>
    %14 = arith.addf %12, %13 : vector<8x1xf32>
    %15 = vector.extract_strided_slice %7 {offsets = [0, 0], sizes = [8, 1], strides = [1, 1]} : vector<32x1xf32> to vector<8x1xf32>
    %16 = vector.extract_strided_slice %7 {offsets = [8, 0], sizes = [8, 1], strides = [1, 1]} : vector<32x1xf32> to vector<8x1xf32>
    %17 = arith.addf %15, %16 : vector<8x1xf32>
    %18 = vector.extract_strided_slice %7 {offsets = [16, 0], sizes = [8, 1], strides = [1, 1]} : vector<32x1xf32> to vector<8x1xf32>
    %19 = arith.addf %17, %18 : vector<8x1xf32>
    %20 = vector.extract_strided_slice %7 {offsets = [24, 0], sizes = [8, 1], strides = [1, 1]} : vector<32x1xf32> to vector<8x1xf32>
    %21 = arith.addf %19, %20 : vector<8x1xf32>
    %cst_5 = arith.constant 4.8828125E-4 : f32
    %22 = vector.broadcast %cst_5 : f32 to vector<8x1xf32>
    %23 = arith.mulf %14, %22 : vector<8x1xf32>
    %cst_6 = arith.constant 4.8828125E-4 : f32
    %24 = vector.broadcast %cst_6 : f32 to vector<8x1xf32>
    %25 = arith.mulf %21, %24 : vector<8x1xf32>
    %26 = arith.mulf %23, %23 : vector<8x1xf32>
    %27 = arith.subf %25, %26 : vector<8x1xf32>
    %cst_7 = arith.constant 0.000000e+00 : f32
    %28 = vector.broadcast %cst_7 : f32 to vector<8x1xf32>
    %29 = arith.maximumf %27, %28 : vector<8x1xf32>
    %c0_8 = arith.constant 0 : index
    %c0_9 = arith.constant 0 : index
    %30 = vector.load %arg2[%c0_8, %c0_9] : memref<8x1xf32, #tpu.memory_space<vmem>>, vector<8x1xf32>
    %cst_10 = arith.constant 9.99999974E-6 : f32
    %31 = vector.broadcast %cst_10 : f32 to vector<8x1xf32>
    %32 = arith.addf %29, %31 : vector<8x1xf32>
    %33 = math.rsqrt %32 : vector<8x1xf32>
    %34 = arith.mulf %30, %33 : vector<8x1xf32>
    %c0_11 = arith.constant 0 : index
    %c0_12 = arith.constant 0 : index
    %35 = vector.load %arg3[%c0_11, %c0_12] : memref<8x1xf32, #tpu.memory_space<vmem>>, vector<8x1xf32>
    %36 = arith.mulf %23, %34 : vector<8x1xf32>
    %37 = arith.subf %35, %36 : vector<8x1xf32>
    %c0_13 = arith.constant 0 : index
    %c0_14 = arith.constant 0 : index
    %38 = vector.load %arg4[%c0_13, %c0_14] : memref<3x8xbf16, #tpu.memory_space<vmem>>, vector<3x8xbf16>
    %39 = vector.extract_strided_slice %2 {offsets = [0, 0], sizes = [8, 512], strides = [1, 1]} : vector<32x512xf32> to vector<8x512xf32>
    %40 = vector.broadcast %34 : vector<8x1xf32> to vector<8x512xf32>
    %41 = arith.mulf %39, %40 : vector<8x512xf32>
    %42 = vector.broadcast %37 : vector<8x1xf32> to vector<8x512xf32>
    %43 = arith.addf %41, %42 : vector<8x512xf32>
    %cst_15 = arith.constant 0.000000e+00 : f32
    %44 = vector.broadcast %cst_15 : f32 to vector<8x512xf32>
    %45 = arith.maximumf %43, %44 : vector<8x512xf32>
    %46 = arith.truncf %45 : vector<8x512xf32> to vector<8x512xbf16>
    %cst_16 = arith.constant dense<0.000000e+00> : vector<3x512xf32>
    %47 = tpu.matmul %38, %46, %cst_16 {dimension_numbers = #tpu.dot_dimension_numbers<[1], [0], [0], [1], [0, 0, 1, 1], [], []>} : vector<3x8xbf16>, vector<8x512xbf16>, vector<3x512xf32> -> vector<3x512xf32>
    %48 = math.tanh %47 : vector<3x512xf32>
    %c0_17 = arith.constant 0 : index
    %c0_18 = arith.constant 0 : index
    %49 = vector.load %arg5[%c0_17, %c0_18] : memref<12x512xf32, #tpu.memory_space<vmem>>, vector<3x512xf32>
    tpu.vector_store %arg5[%c0_17, %c0_18], %48 {strides = array<i32>} : memref<12x512xf32, #tpu.memory_space<vmem>>, vector<3x512xf32>,
    %50 = vector.extract_strided_slice %2 {offsets = [8, 0], sizes = [8, 512], strides = [1, 1]} : vector<32x512xf32> to vector<8x512xf32>
    %51 = vector.broadcast %34 : vector<8x1xf32> to vector<8x512xf32>
    %52 = arith.mulf %50, %51 : vector<8x512xf32>
    %53 = vector.broadcast %37 : vector<8x1xf32> to vector<8x512xf32>
    %54 = arith.addf %52, %53 : vector<8x512xf32>
    %cst_19 = arith.constant 0.000000e+00 : f32
    %55 = vector.broadcast %cst_19 : f32 to vector<8x512xf32>
    %56 = arith.maximumf %54, %55 : vector<8x512xf32>
    %57 = arith.truncf %56 : vector<8x512xf32> to vector<8x512xbf16>
    %cst_20 = arith.constant dense<0.000000e+00> : vector<3x512xf32>
    %58 = tpu.matmul %38, %57, %cst_20 {dimension_numbers = #tpu.dot_dimension_numbers<[1], [0], [0], [1], [0, 0, 1, 1], [], []>} : vector<3x8xbf16>, vector<8x512xbf16>, vector<3x512xf32> -> vector<3x512xf32>
    %59 = math.tanh %58 : vector<3x512xf32>
    %c3 = arith.constant 3 : index
    %c0_21 = arith.constant 0 : index
    %60 = vector.load %arg5[%c3, %c0_21] : memref<12x512xf32, #tpu.memory_space<vmem>>, vector<3x512xf32>
    tpu.vector_store %arg5[%c3, %c0_21], %59 {strides = array<i32>} : memref<12x512xf32, #tpu.memory_space<vmem>>, vector<3x512xf32>,
    %61 = vector.extract_strided_slice %2 {offsets = [16, 0], sizes = [8, 512], strides = [1, 1]} : vector<32x512xf32> to vector<8x512xf32>
    %62 = vector.broadcast %34 : vector<8x1xf32> to vector<8x512xf32>
    %63 = arith.mulf %61, %62 : vector<8x512xf32>
    %64 = vector.broadcast %37 : vector<8x1xf32> to vector<8x512xf32>
    %65 = arith.addf %63, %64 : vector<8x512xf32>
    %cst_22 = arith.constant 0.000000e+00 : f32
    %66 = vector.broadcast %cst_22 : f32 to vector<8x512xf32>
    %67 = arith.maximumf %65, %66 : vector<8x512xf32>
    %68 = arith.truncf %67 : vector<8x512xf32> to vector<8x512xbf16>
    %cst_23 = arith.constant dense<0.000000e+00> : vector<3x512xf32>
    %69 = tpu.matmul %38, %68, %cst_23 {dimension_numbers = #tpu.dot_dimension_numbers<[1], [0], [0], [1], [0, 0, 1, 1], [], []>} : vector<3x8xbf16>, vector<8x512xbf16>, vector<3x512xf32> -> vector<3x512xf32>
    %70 = math.tanh %69 : vector<3x512xf32>
    %c6 = arith.constant 6 : index
    %c0_24 = arith.constant 0 : index
    %71 = vector.load %arg5[%c6, %c0_24] : memref<12x512xf32, #tpu.memory_space<vmem>>, vector<3x512xf32>
    tpu.vector_store %arg5[%c6, %c0_24], %70 {strides = array<i32>} : memref<12x512xf32, #tpu.memory_space<vmem>>, vector<3x512xf32>,
    %72 = vector.extract_strided_slice %2 {offsets = [24, 0], sizes = [8, 512], strides = [1, 1]} : vector<32x512xf32> to vector<8x512xf32>
    %73 = vector.broadcast %34 : vector<8x1xf32> to vector<8x512xf32>
    %74 = arith.mulf %72, %73 : vector<8x512xf32>
    %75 = vector.broadcast %37 : vector<8x1xf32> to vector<8x512xf32>
    %76 = arith.addf %74, %75 : vector<8x512xf32>
    %cst_25 = arith.constant 0.000000e+00 : f32
    %77 = vector.broadcast %cst_25 : f32 to vector<8x512xf32>
    %78 = arith.maximumf %76, %77 : vector<8x512xf32>
    %79 = arith.truncf %78 : vector<8x512xf32> to vector<8x512xbf16>
    %cst_26 = arith.constant dense<0.000000e+00> : vector<3x512xf32>
    %80 = tpu.matmul %38, %79, %cst_26 {dimension_numbers = #tpu.dot_dimension_numbers<[1], [0], [0], [1], [0, 0, 1, 1], [], []>} : vector<3x8xbf16>, vector<8x512xbf16>, vector<3x512xf32> -> vector<3x512xf32>
    %81 = math.tanh %80 : vector<3x512xf32>
    %c9 = arith.constant 9 : index
    %c0_27 = arith.constant 0 : index
    %82 = vector.load %arg5[%c9, %c0_27] : memref<12x512xf32, #tpu.memory_space<vmem>>, vector<3x512xf32>
    tpu.vector_store %arg5[%c9, %c0_27], %81 {strides = array<i32>} : memref<12x512xf32, #tpu.memory_space<vmem>>, vector<3x512xf32>,
    return
  }
}

</mosaic_0001>

<bundles_post_ra>
// kernel: generator_forward.4
= control target key start
LH: loop header
LB: loop body
LE: loop exit
PB: predicated region body
PF: predicated region fallthrough
CT: control target
= control target key end

     0   :  { %9 = vsyncpa [#allocation3], 0  ;;  %s1087_s0 = inlined_call_operand.vmem [shape: f32[8,32], index: 0, kind: input, shape index: {}]   ;;  %s1088_s1 = inlined_call_operand.hbm [shape: f32[32,1024], index: 1, kind: input, shape index: {}]   ;;  %s1089_s2 = inlined_call_operand.hbm [shape: f32[1,1024], index: 2, kind: input, shape index: {}]   ;;  %s1090_s3 = inlined_call_operand.hbm [shape: f32[1,1024], index: 3, kind: input, shape index: {}]   ;;  %s1091_s4 = inlined_call_operand.vmem [shape: bf16[8,1024], index: 4, kind: output, shape index: {}]  }
   0x1   :  { %10 = vsyncpa [#allocation5], 0  ;;  %s910_s15 = smov [#allocation4]   ;;  %s911_s17 = smov [#allocation2]  }
   0x2   :  { %s31_s16 = sshll.u32 %s910_s15, 4  ;;  %s18_s18 = sshll.u32 %s911_s17, 4  ;;  %s32_s16 = int_to_ptr.vmem [resolvable:$true] %s31_s16  ;;  %s19_s18 = int_to_ptr.vmem [resolvable:$true] %s18_s18 }
   0x3   :  { %s854_s19 = scalar_lea.vmem %s32_s16, 128  ;;  %p859_p1 = scmp.lt.s32.totalorder %s32_s16, %s32_s16 }
   0x4   :  { %p855_p0 = scmp.ne.s32.totalorder %s32_s16, %s854_s19  ;;  %p860_p2 = scmp.lt.s32.totalorder %s854_s19, %s854_s19 }
   0x6   :  { %p861_p3 = por %p860_p2, %p859_p1 }
   0x8   :  { %p862_p4 = pnand %p861_p3, %p855_p0 }
   0xa   :  { %865 = shalt.err (!%p862_p4)
}
   0xb   :  { %34 = dma.hbm_to_vmem [thread:$0]  %s1089_s2, 128, %s32_s16, [#allocation5]  }
   0xc   :  { %s874_s22 = scalar_lea.vmem %s19_s18, 4096  ;;  %p879_p6 = scmp.lt.s32.totalorder %s19_s18, %s19_s18 }
   0xd   :  { %p875_p5 = scmp.ne.s32.totalorder %s19_s18, %s874_s22  ;;  %p880_p7 = scmp.lt.s32.totalorder %s874_s22, %s874_s22 }
   0xf   :  { %p881_p8 = por %p880_p7, %p879_p6 }
  0x11   :  { %p882_p9 = pnand %p881_p8, %p875_p5 }
  0x13   :  { %885 = shalt.err (!%p882_p9)
}
  0x14   :  { %s912_s23 = smov 1024   ;;  %s913_s24 = smov 64  }
  0x15   :  { %24 = dma.hbm_to_vmem [thread:$0]  %s1088_s1, 4096, %s19_s18, [#allocation3], %s912_s23, %s912_s23, %s913_s24  }
  0x16   :  { %s914_s27 = smov [#allocation6]  }
  0x17   :  { %s41_s28 = sshll.u32 %s914_s27, 4  ;;  %s42_s28 = int_to_ptr.vmem [resolvable:$true] %s41_s28 }
  0x18   :  { %s894_s29 = scalar_lea.vmem %s42_s28, 128  ;;  %p899_p11 = scmp.lt.s32.totalorder %s42_s28, %s42_s28 }
  0x19   :  { %p895_p10 = scmp.ne.s32.totalorder %s42_s28, %s894_s29  ;;  %p900_p12 = scmp.lt.s32.totalorder %s894_s29, %s894_s29 }
  0x1b   :  { %p901_p13 = por %p900_p12, %p899_p11 }
  0x1d   :  { %p902_p0 = pnand %p901_p13, %p895_p10 }
  0x1f   :  { %905 = shalt.err (!%p902_p0)
}
  0x20   :  { %44 = dma.hbm_to_vmem [thread:$0]  %s1090_s3, 128, %s42_s28, [#allocation5]  }
  0x21   :  { %906 = dma.done.wait [#allocation3], 4096  }
  0x22   :  { %907 = vsyncadd [#allocation3], 4294963200 }
  0x23   :  { %908 = dma.done.wait [#allocation5], 256  }
  0x24   :  { %909 = vsyncadd [#allocation5], 4294967040  ;;  %v915_v0 = vmov 0.0   ;;  %v80_v1 = vld [vmem:[#allocation2 + $0xc8] sm:$0xff]  ;;  %v82_v2 = vld [vmem:[#allocation2 + $0xd8] sm:$0xff]  ;;  %vm87_vm0 = vcmask 261120  }
  0x25   :  { %155 = vmatprep.mubr.f32.mxu0 %v915_v0  ;;  %226 = vmatprep.mubr.f32.mxu1 %v915_v0  ;;  %v79_v3 = vld [vmem:[#allocation2 + $0xc0] sm:$0xff]  ;;  %v81_v4 = vld [vmem:[#allocation2 + $0xd0] sm:$0xff]  ;;  %v72_v5 = vld [vmem:[#allocation2 + $0x88] sm:$0xff] }
  0x26   :  { %115 = vmatprep.subr.mxu0 %v80_v1  ;;  %186 = vmatprep.subr.mxu1 %v82_v2  ;;  %v74_v6 = vld [vmem:[#allocation2 + $0x98] sm:$0xff]  ;;  %v71_v7 = vld [vmem:[#allocation2 + $0x80] sm:$0xff]  ;;  %v73_v8 = vld [vmem:[#allocation2 + $0x90] sm:$0xff] }
  0x27   :  { %116 = vmatpush1.msra.mxu0 %v79_v3  ;;  %187 = vmatpush1.msra.mxu1 %v81_v4  ;;  %v64_v9 = vld [vmem:[#allocation2 + $0x48] sm:$0xff]  ;;  %v66_v10 = vld [vmem:[#allocation2 + $0x58] sm:$0xff]  ;;  %v63_v11 = vld [vmem:[#allocation2 + $0x40] sm:$0xff] }
  0x28   :  { %117 = vmatprep.subr.mxu0 %v72_v5  ;;  %188 = vmatprep.subr.mxu1 %v74_v6  ;;  %v65_v12 = vld [vmem:[#allocation2 + $0x50] sm:$0xff]  ;;  %v56_v13 = vld [vmem:[#allocation2 + $0x8] sm:$0xff]  ;;  %v58_v14 = vld [vmem:[#allocation2 + $0x18] sm:$0xff] }
  0x29   :  { %118 = vmatpush1.msra.mxu0 %v71_v7  ;;  %189 = vmatpush1.msra.mxu1 %v73_v8  ;;  %v55_v15 = vld [vmem:[#allocation2] sm:$0xff]  ;;  %v57_v16 = vld [vmem:[#allocation2 + $0x10] sm:$0xff]  ;;  %v84_v18 = vld [vmem:[#allocation2 + $0xe8] sm:$0xff] }
  0x2a   :  { %119 = vmatprep.subr.mxu0 %v64_v9  ;;  %190 = vmatprep.subr.mxu1 %v66_v10  ;;  %v54_v17 = vld [vmem:[%s1087_s0] sm:$0xff]  ;;  %v86_v19 = vld [vmem:[#allocation2 + $0xf8] sm:$0xff]  ;;  %v85_v21 = vld [vmem:[#allocation2 + $0xf0] sm:$0xff] }
  0x2b   :  { %120 = vmatpush1.msra.mxu0 %v63_v11  ;;  %191 = vmatpush1.msra.mxu1 %v65_v12  ;;  %v83_v20 = vld [vmem:[#allocation2 + $0xe0] sm:$0xff]  ;;  %v76_v22 = vld [vmem:[#allocation2 + $0xa8] sm:$0xff]  ;;  %v78_v23 = vld [vmem:[#allocation2 + $0xb8] sm:$0xff] }
  0x2c   :  { %121 = vmatprep.subr.mxu0 %v56_v13  ;;  %192 = vmatprep.subr.mxu1 %v58_v14  ;;  %v75_v24 = vld [vmem:[#allocation2 + $0xa0] sm:$0xff]  ;;  %v77_v25 = vld [vmem:[#allocation2 + $0xb0] sm:$0xff]  ;;  %v68_v26 = vld [vmem:[#allocation2 + $0x68] sm:$0xff] }
  0x2d   :  { %122 = vmatpush1.msra.mxu0 %v55_v15  ;;  %193 = vmatpush1.msra.mxu1 %v57_v16  ;;  %v70_v27 = vld [vmem:[#allocation2 + $0x78] sm:$0xff]  ;;  %v67_v28 = vld [vmem:[#allocation2 + $0x60] sm:$0xff]  ;;  %v69_v29 = vld [vmem:[#allocation2 + $0x70] sm:$0xff] }
  0x2e   :  { %811 = vmatmul.mubr.msk.f32.vlgmr.msra.gmra.mxu0 %vm87_vm0, %v54_v17  ;;  %812 = vmatmul.mubr.msk.f32.vlgmr.msra.gmra.mxu1 %vm87_vm0, %v54_v17  ;;  %v60_v30 = vld [vmem:[#allocation2 + $0x28] sm:$0xff]  ;;  %v62_v31 = vld [vmem:[#allocation2 + $0x38] sm:$0xff]  ;;  %v59_v32 = vld [vmem:[#allocation2 + $0x20] sm:$0xff] }
  0x2f   :  { %257 = vmatprep.subr.mxu0 %v84_v18  ;;  %328 = vmatprep.subr.mxu1 %v86_v19  ;;  %v61_v33 = vld [vmem:[#allocation2 + $0x30] sm:$0xff] }
  0x30   :  { %258 = vmatpush1.msra.mxu0 %v83_v20  ;;  %329 = vmatpush1.msra.mxu1 %v85_v21 }
  0x31   :  { %259 = vmatprep.subr.mxu0 %v76_v22  ;;  %330 = vmatprep.subr.mxu1 %v78_v23 }
  0x32   :  { %260 = vmatpush1.msra.mxu0 %v75_v24  ;;  %331 = vmatpush1.msra.mxu1 %v77_v25 }
  0x33   :  { %261 = vmatprep.subr.mxu0 %v68_v26  ;;  %332 = vmatprep.subr.mxu1 %v70_v27 }
  0x34   :  { %262 = vmatpush1.msra.mxu0 %v67_v28  ;;  %333 = vmatpush1.msra.mxu1 %v69_v29 }
  0x35   :  { %263 = vmatprep.subr.mxu0 %v60_v30  ;;  %334 = vmatprep.subr.mxu1 %v62_v31 }
  0x36   :  { %264 = vmatpush1.msra.mxu0 %v59_v32  ;;  %297 = vmatprep.mubr.f32.mxu0 %v915_v0 }
  0x37   :  { %335 = vmatpush1.msra.mxu1 %v61_v33  ;;  %368 = vmatprep.mubr.f32.mxu1 %v915_v0 }
  0x38   :  { %813 = vmatmul.mubr.msk.f32.vlgmr.msra.gmra.mxu0 %vm87_vm0, %v54_v17  ;;  %814 = vmatmul.mubr.msk.f32.vlgmr.msra.gmra.mxu1 %vm87_vm0, %v54_v17 }
  0xee   :  { %v962_v34 = vpop.f32.mrf.mxu0  ;;  %v964_v35 = vpop.f32.mrf.mxu1 }
  0xef   :  { %v375_v36 = vrot.slane %v962_v34, 4  ;;  %v431_v37 = vmul.f32 %v962_v34, %v962_v34  ;;  %v387_v38 = vrot.slane %v964_v35, 4  ;;  %v433_v39 = vmul.f32 %v964_v35, %v964_v35 }
  0xf0   :  { %v972_v40 = vpop.f32.mrf.mxu0  ;;  %v974_v41 = vpop.f32.mrf.mxu1 }
  0xf1   :  { %v376_v42 = vadd.f32 %v375_v36, %v962_v34  ;;  %v439_v43 = vrot.slane %v431_v37, 4  ;;  %v388_v44 = vadd.f32 %v387_v38, %v964_v35  ;;  %v451_v45 = vrot.slane %v433_v39, 4 }
  0xf2   :  { %v381_v46 = vrot.slane %v972_v40, 4  ;;  %v432_v47 = vmul.f32 %v972_v40, %v972_v40  ;;  %v393_v48 = vrot.slane %v974_v41, 4  ;;  %v434_v49 = vmul.f32 %v974_v41, %v974_v41 }
  0xf3   :  { %v377_v50 = vrot.slane %v376_v42, 2  ;;  %v440_v51 = vadd.f32 %v439_v43, %v431_v37  ;;  %v389_v52 = vrot.slane %v388_v44, 2  ;;  %v452_v53 = vadd.f32 %v451_v45, %v433_v39 }
  0xf4   :  { %v382_v54 = vadd.f32 %v381_v46, %v972_v40  ;;  %v445_v55 = vrot.slane %v432_v47, 4  ;;  %v394_v56 = vadd.f32 %v393_v48, %v974_v41  ;;  %v457_v57 = vrot.slane %v434_v49, 4 }
  0xf5   :  { %v378_v58 = vadd.f32 %v377_v50, %v376_v42  ;;  %v441_v59 = vrot.slane %v440_v51, 2  ;;  %v390_v60 = vadd.f32 %v389_v52, %v388_v44  ;;  %v453_v61 = vrot.slane %v452_v53, 2 }
  0xf6   :  { %v383_v62 = vrot.slane %v382_v54, 2  ;;  %v446_v63 = vadd.f32 %v445_v55, %v432_v47  ;;  %v395_v0 = vrot.slane %v394_v56, 2  ;;  %v458_v1 = vadd.f32 %v457_v57, %v434_v49 }
  0xf7   :  { %v379_v2 = vrot.slane %v378_v58, 1  ;;  %v442_v3 = vadd.f32 %v441_v59, %v440_v51  ;;  %v391_v4 = vrot.slane %v390_v60, 1  ;;  %v454_v11 = vadd.f32 %v453_v61, %v452_v53 }
  0xf8   :  { %v384_v5 = vadd.f32 %v383_v62, %v382_v54  ;;  %v447_v6 = vrot.slane %v446_v63, 2  ;;  %v396_v7 = vadd.f32 %v395_v0, %v394_v56  ;;  %v459_v8 = vrot.slane %v458_v1, 2  ;;  %v986_v20 = vpop.f32.mrf.mxu0  ;;  %v993_v28 = vpop.f32.mrf.mxu1 }
  0xf9   :  { %v380_v9 = vadd.f32 %v379_v2, %v378_v58  ;;  %v443_v10 = vrot.slane %v442_v3, 1  ;;  %v392_v16 = vadd.f32 %v391_v4, %v390_v60  ;;  %v455_v21 = vrot.slane %v454_v11, 1 }
  0xfa   :  { %v385_v12 = vrot.slane %v384_v5, 1  ;;  %v448_v13 = vadd.f32 %v447_v6, %v446_v63  ;;  %v397_v14 = vrot.slane %v396_v7, 1  ;;  %v460_v15 = vadd.f32 %v459_v8, %v458_v1  ;;  %v1011_v44 = vpop.f32.mrf.mxu0  ;;  %v1019_v56 = vpop.f32.mrf.mxu1 }
  0xfb   :  { %v988_v23 = vmul.f32 0.5, %v380_v9  ;;  %v444_v24 = vadd.f32 %v443_v10, %v442_v3  ;;  %v399_v26 = vrot.slane %v986_v20, 4  ;;  %v435_v27 = vmul.f32 %v986_v20, %v986_v20 }
  0xfc   :  { %v386_v17 = vadd.f32 %v385_v12, %v384_v5  ;;  %v449_v18 = vrot.slane %v448_v13, 1  ;;  %v461_v19 = vrot.slane %v460_v15, 1  ;;  %v398_v22 = vadd.f32 %v397_v14, %v396_v7 }
  0xfd   :  { %v995_v29 = vmul.f32 0.5, %v392_v16  ;;  %v456_v32 = vadd.f32 %v455_v21, %v454_v11  ;;  %v400_v36 = vadd.f32 %v399_v26, %v986_v20  ;;  %v463_v37 = vrot.slane %v435_v27, 4 }
  0xfe   :  { %v450_v25 = vadd.f32 %v449_v18, %v448_v13  ;;  %v997_v30 = vmul.f32 0.5, %v386_v17  ;;  %v462_v31 = vadd.f32 %v461_v19, %v460_v15  ;;  %v999_v33 = vmul.f32 0.5, %v398_v22 }
  0xff   :  { %v1002_v38 = vmul.f32 0.5, %v444_v24  ;;  %v1006_v39 = vmul.f32 %v988_v23, %v988_v23  ;;  %v411_v42 = vrot.slane %v993_v28, 4  ;;  %v437_v43 = vmul.f32 %v993_v28, %v993_v28 }
 0x100   :  { %v488_v45 = vmul.f32 0.5, %v450_v25  ;;  %v401_v46 = vrot.slane %v400_v36, 2  ;;  %v464_v47 = vadd.f32 %v463_v37, %v435_v27  ;;  %v496_v48 = vmul.f32 %v997_v30, %v997_v30 }
 0x101   :  { %v490_v49 = vmul.f32 0.5, %v462_v31  ;;  %v412_v50 = vadd.f32 %v411_v42, %v993_v28  ;;  %v475_v51 = vrot.slane %v437_v43, 4  ;;  %v498_v52 = vmul.f32 %v999_v33, %v999_v33 }
 0x102   :  { %v402_v53 = vadd.f32 %v401_v46, %v400_v36  ;;  %v465_v54 = vrot.slane %v464_v47, 2  ;;  %v405_v55 = vrot.slane %v1011_v44, 4  ;;  %v503_v57 = vsub.f32 %v1002_v38, %v1006_v39 }
 0x103   :  { %v489_v58 = vmul.f32 0.5, %v456_v32  ;;  %v497_v59 = vmul.f32 %v995_v29, %v995_v29  ;;  %v413_v60 = vrot.slane %v412_v50, 2  ;;  %v476_v63 = vadd.f32 %v475_v51, %v437_v43 }
 0x104   :  { %v403_v61 = vrot.slane %v402_v53, 1  ;;  %v466_v62 = vadd.f32 %v465_v54, %v464_v47  ;;  %v406_v0 = vadd.f32 %v405_v55, %v1011_v44  ;;  %v504_v1 = vsub.f32 %v488_v45, %v496_v48 }
 0x105   :  { %v414_v2 = vadd.f32 %v413_v60, %v412_v50  ;;  %v436_v3 = vmul.f32 %v1011_v44, %v1011_v44  ;;  %v417_v4 = vrot.slane %v1019_v56, 4  ;;  %v506_v5 = vsub.f32 %v490_v49, %v498_v52 }
 0x106   :  { %v404_v6 = vadd.f32 %v403_v61, %v402_v53  ;;  %v467_v7 = vrot.slane %v466_v62, 1  ;;  %v477_v8 = vrot.slane %v476_v63, 2  ;;  %v407_v10 = vrot.slane %v406_v0, 2 }
 0x107   :  { %v415_v9 = vrot.slane %v414_v2, 1  ;;  %v469_v11 = vrot.slane %v436_v3, 4  ;;  %v418_v12 = vadd.f32 %v417_v4, %v1019_v56  ;;  %v438_v16 = vmul.f32 %v1019_v56, %v1019_v56 }
 0x108   :  { %v1030_v13 = vmul.f32 0.5, %v404_v6  ;;  %v468_v14 = vadd.f32 %v467_v7, %v466_v62  ;;  %v478_v15 = vadd.f32 %v477_v8, %v476_v63  ;;  %v408_v18 = vadd.f32 %v407_v10, %v406_v0 }
 0x109   :  { %v416_v17 = vadd.f32 %v415_v9, %v414_v2  ;;  %v470_v19 = vadd.f32 %v469_v11, %v436_v3  ;;  %v419_v21 = vrot.slane %v418_v12, 2  ;;  %v481_v26 = vrot.slane %v438_v16, 4 }
 0x10a   :  { %v491_v22 = vmul.f32 0.5, %v468_v14  ;;  %v499_v24 = vmul.f32 %v1030_v13, %v1030_v13  ;;  %v479_v25 = vrot.slane %v478_v15, 1  ;;  %v409_v31 = vrot.slane %v408_v18, 1 }
 0x10b   :  { %v1036_v27 = vmul.f32 0.5, %v416_v17  ;;  %v471_v32 = vrot.slane %v470_v19, 2  ;;  %v420_v36 = vadd.f32 %v419_v21, %v418_v12  ;;  %v505_v37 = vsub.f32 %v489_v58, %v497_v59 }
 0x10c   :  { %v512_v38 = vmax.f32 %v504_v1, 0.0  ;;  %v480_v39 = vadd.f32 %v479_v25, %v478_v15  ;;  %v482_v42 = vadd.f32 %v481_v26, %v438_v16  ;;  %v410_v45 = vadd.f32 %v409_v31, %v408_v18 }
 0x10d   :  { %v501_v43 = vmul.f32 %v1036_v27, %v1036_v27  ;;  %v472_v46 = vadd.f32 %v471_v32, %v470_v19  ;;  %v421_v47 = vrot.slane %v420_v36, 1  ;;  %v514_v48 = vmax.f32 %v506_v5, 0.0 }
 0x10e   :  { %v507_v49 = vsub.f32 %v491_v22, %v499_v24  ;;  %v493_v50 = vmul.f32 0.5, %v480_v39  ;;  %v483_v51 = vrot.slane %v482_v42, 2  ;;  %v511_v52 = vmax.f32 %v503_v57, 0.0 }
 0x10f   :  { %v1040_v53 = vmul.f32 0.5, %v410_v45  ;;  %v473_v54 = vrot.slane %v472_v46, 1  ;;  %v422_v55 = vadd.f32 %v421_v47, %v420_v36  ;;  %v513_v60 = vmax.f32 %v505_v37, 0.0 }
 0x110   :  { %v521_v58 = vadd.f32 1e-05, %v512_v38  ;;  %v484_v59 = vadd.f32 %v483_v51, %v482_v42  ;;  %v509_v61 = vsub.f32 %v493_v50, %v501_v43  ;;  %v523_v1 = vadd.f32 1e-05, %v514_v48 }
 0x111   :  { %v474_v62 = vadd.f32 %v473_v54, %v472_v46  ;;  %v500_v63 = vmul.f32 %v1040_v53, %v1040_v53  ;;  %v1044_v0 = vmul.f32 0.5, %v422_v55  ;;  %v515_v2 = vmax.f32 %v507_v49, 0.0 }
 0x112   :  { %v485_v3 = vrot.slane %v484_v59, 1  ;;  %v520_v4 = vadd.f32 1e-05, %v511_v52  ;;  %v522_v57 = vadd.f32 1e-05, %v513_v60  ;;  %830 = vrsqrt.f32 %v521_v58 }
 0x113   :  { %v492_v5 = vmul.f32 0.5, %v474_v62  ;;  %v502_v7 = vmul.f32 %v1044_v0, %v1044_v0  ;;  %v517_v8 = vmax.f32 %v509_v61, 0.0  ;;  %832 = vrsqrt.f32 %v523_v1 }
 0x114   :  { %v486_v6 = vadd.f32 %v485_v3, %v484_v59  ;;  %v524_v10 = vadd.f32 1e-05, %v515_v2  ;;  %834 = vrsqrt.f32 %v520_v4  ;;  %v916_v19 = vmov 1966171168   ;;  %v519_v59 = vld [vmem:[#allocation4] sm:$0xff] }
 0x115   :  { %v508_v9 = vsub.f32 %v492_v5, %v500_v63  ;;  %836 = vrsqrt.f32 %v522_v57  ;;  %v526_v15 = vadd.f32 1e-05, %v517_v8  ;;  %v549_v21 = vunpack.c.l.s4 %v916_v19 }
 0x116   :  { %v494_v11 = vmul.f32 0.5, %v486_v6  ;;  %838 = vrsqrt.f32 %v524_v10  ;;  %v551_v22 = vlaneseq }
 0x117   :  { %v516_v12 = vmax.f32 %v508_v9, 0.0  ;;  %v550_v25 = vunpack.c.0.s8 %v549_v21 }
 0x118   :  { %v510_v14 = vsub.f32 %v494_v11, %v502_v7  ;;  %v1048_v26 = vshrl.u32 %v551_v22, 7 }
 0x119   :  { %v525_v16 = vadd.f32 1e-05, %v516_v12 }
 0x11a   :  { %v518_v17 = vmax.f32 %v510_v14, 0.0  ;;  %v553_v38 = vsub.s32 %v550_v25, %v1048_v26  ;;  %v599_v61 = vsub.s32 0, %v1048_v26  ;;  %v603_v63 = vsub.s32 1, %v1048_v26 }
 0x11b   :  { %840 = vrsqrt.f32 %v525_v16  ;;  %v607_v1 = vsub.s32 2, %v1048_v26  ;;  %v611_v2 = vsub.s32 3, %v1048_v26  ;;  %v615_v3 = vsub.s32 4, %v1048_v26 }
 0x11c   :  { %v527_v18 = vadd.f32 1e-05, %v518_v17  ;;  %842 = vrsqrt.f32 %v526_v15  ;;  %v619_v4 = vsub.s32 5, %v1048_v26  ;;  %v623_v5 = vsub.s32 6, %v1048_v26 }
 0x11d   :  { %v627_v57 = vsub.s32 7, %v1048_v26 }
 0x11e   :  { %844 = vrsqrt.f32 %v527_v18 }
 0x11f   :  { %v831_v24 = vpop.eup %830 }
 0x120   :  { %v833_v31 = vpop.eup %832 }
 0x121   :  { %v835_v32 = vpop.eup %834 }
 0x122   :  { %v837_v36 = vpop.eup %836  ;;  %v544_v37 = vcombine.low %v835_v32, %v831_v24 }
 0x123   :  { %v545_v39 = vcombine.low %v837_v36, %v833_v31  ;;  %v839_v42 = vpop.eup %838 }
 0x124   :  { %v554_v47 = vrot.slane %v544_v37, %v553_v38 }
 0x125   :  { %v561_v48 = vrot.slane %v545_v39, %v553_v38 }
 0x127   :  { %v576_v52 = vcombine.low %v554_v47, %v561_v48 }
 0x128   :  { %v841_v43 = vpop.eup %840 }
 0x129   :  { %v546_v45 = vcombine.low %v839_v42, %v841_v43  ;;  %v843_v46 = vpop.eup %842  ;;  %v584_v60 = vrot.slane %v576_v52, %v553_v38 }
 0x12b   :  { %v845_v49 = vpop.eup %844  ;;  %v568_v50 = vrot.slane %v546_v45, %v553_v38  ;;  %v595_v45 = vld [vmem:[#allocation6] sm:$0xff] }
 0x12c   :  { %v547_v51 = vcombine.low %v843_v46, %v845_v49 }
 0x12e   :  { %v575_v54 = vrot.slane %v547_v51, %v553_v38 }
 0x130   :  { %v577_v55 = vcombine.low %v568_v50, %v575_v54 }
 0x132   :  { %v591_v58 = vrot.slane %v577_v55, %v553_v38 }
 0x134   :  { %v592_v62 = vcombine.low %v584_v60, %v591_v58 }
 0x136   :  { %v594_v6 = vmul.f32 %v592_v62, %v519_v59 }
 0x138   :  { %v600_v7 = vrot.slane %v594_v6, %v599_v61  ;;  %v604_v8 = vrot.slane %v594_v6, %v603_v63  ;;  %v608_v9 = vrot.slane %v594_v6, %v607_v1  ;;  %v612_v10 = vrot.slane %v594_v6, %v611_v2 }
 0x139   :  { %v616_v11 = vrot.slane %v594_v6, %v615_v3  ;;  %v620_v12 = vrot.slane %v594_v6, %v619_v4  ;;  %v624_v14 = vrot.slane %v594_v6, %v623_v5  ;;  %v628_v15 = vrot.slane %v594_v6, %v627_v57 }
 0x13a   :  { %v637_v16 = vmul.f32 %v600_v7, %v988_v23  ;;  %v638_v17 = vmul.f32 %v604_v8, %v997_v30  ;;  %v639_v18 = vmul.f32 %v608_v9, %v995_v29  ;;  %v640_v19 = vmul.f32 %v612_v10, %v999_v33 }
 0x13b   :  { %v641_v21 = vmul.f32 %v616_v11, %v1030_v13  ;;  %v642_v22 = vmul.f32 %v620_v12, %v1040_v53  ;;  %v643_v24 = vmul.f32 %v624_v14, %v1036_v27  ;;  %v644_v25 = vmul.f32 %v628_v15, %v1044_v0 }
 0x13c   :  { %v653_v26 = vcombine.low %v637_v16, %v638_v17  ;;  %v654_v31 = vcombine.low %v639_v18, %v640_v19  ;;  %v704_v53 = vmul.f32 %v600_v7, %v962_v34  ;;  %v705_v27 = vmul.f32 %v604_v8, %v972_v40 }
 0x13d   :  { %v655_v32 = vcombine.low %v641_v21, %v642_v22  ;;  %v656_v36 = vcombine.low %v643_v24, %v644_v25  ;;  %v706_v0 = vmul.f32 %v608_v9, %v964_v35  ;;  %v707_v47 = vmul.f32 %v612_v10, %v974_v41 }
 0x13e   :  { %v663_v37 = vrot.slane %v653_v26, %v553_v38  ;;  %v670_v23 = vrot.slane %v654_v31, %v553_v38  ;;  %v708_v48 = vmul.f32 %v616_v11, %v986_v20  ;;  %v709_v49 = vmul.f32 %v620_v12, %v1011_v44 }
 0x13f   :  { %v677_v39 = vrot.slane %v655_v32, %v553_v38  ;;  %v684_v30 = vrot.slane %v656_v36, %v553_v38  ;;  %v710_v50 = vmul.f32 %v624_v14, %v993_v28  ;;  %v711_v51 = vmul.f32 %v628_v15, %v1019_v56 }
 0x140   :  { %v685_v42 = vcombine.low %v663_v37, %v670_v23 }
 0x141   :  { %v686_v29 = vcombine.low %v677_v39, %v684_v30 }
 0x142   :  { %v693_v43 = vrot.slane %v685_v42, %v553_v38 }
 0x143   :  { %v700_v33 = vrot.slane %v686_v29, %v553_v38 }
 0x145   :  { %v701_v13 = vcombine.low %v693_v43, %v700_v33 }
 0x147   :  { %v703_v46 = vsub.f32 %v595_v45, %v701_v13 }
 0x149   :  { %v716_v38 = vrot.slane %v703_v46, %v599_v61  ;;  %v720_v52 = vrot.slane %v703_v46, %v603_v63  ;;  %v724_v54 = vrot.slane %v703_v46, %v607_v1  ;;  %v728_v55 = vrot.slane %v703_v46, %v611_v2 }
 0x14a   :  { %v732_v34 = vrot.slane %v703_v46, %v615_v3  ;;  %v736_v60 = vrot.slane %v703_v46, %v619_v4  ;;  %v740_v58 = vrot.slane %v703_v46, %v623_v5  ;;  %v744_v40 = vrot.slane %v703_v46, %v627_v57 }
 0x14b   :  { %v753_v59 = vadd.f32 %v716_v38, %v704_v53  ;;  %v754_v35 = vadd.f32 %v720_v52, %v705_v27  ;;  %v755_v62 = vadd.f32 %v724_v54, %v706_v0  ;;  %v756_v41 = vadd.f32 %v728_v55, %v707_v47 }
 0x14c   :  { %v757_v6 = vadd.f32 %v732_v34, %v708_v48  ;;  %v758_v20 = vadd.f32 %v736_v60, %v709_v49  ;;  %v759_v7 = vadd.f32 %v740_v58, %v710_v50  ;;  %v760_v44 = vadd.f32 %v744_v40, %v711_v51 }
 0x14d   :  { %v761_v8 = vmax.f32 %v753_v59, 0.0  ;;  %v762_v28 = vmax.f32 %v754_v35, 0.0  ;;  %v763_v9 = vmax.f32 %v755_v62, 0.0  ;;  %v764_v56 = vmax.f32 %v756_v41, 0.0 }
 0x14e   :  { %v765_v61 = vmax.f32 %v757_v6, 0.0  ;;  %v766_v63 = vmax.f32 %v758_v20, 0.0  ;;  %v767_v1 = vmax.f32 %v759_v7, 0.0  ;;  %v768_v2 = vmax.f32 %v760_v44, 0.0 }
 0x14f   :  { %v819_v3 = vpack.c.bf16 %v762_v28, %v761_v8  ;;  %v820_v4 = vpack.c.bf16 %v764_v56, %v763_v9 }
 0x150   :  { %v821_v5 = vpack.c.bf16 %v766_v63, %v765_v61  ;;  %v822_v57 = vpack.c.bf16 %v768_v2, %v767_v1 }
 0x151   :  { %801 = vst [vmem:[%s1091_s4] sm:$0xff] %v819_v3  ;;  %802 = vst [vmem:[%s1091_s4 + $0x8] sm:$0xff] %v820_v4 }
 0x152   :  { %803 = vst [vmem:[%s1091_s4 + $0x10] sm:$0xff] %v821_v5  ;;  %804 = vst [vmem:[%s1091_s4 + $0x18] sm:$0xff] %v822_v57 }
 0x153   :  { %809 = vsyncpa [#allocation3], 1 }
 0x154   :  { %810 = vsyncpa [#allocation5], 1 }

// kernel: generator_forward.5
= control target key start
LH: loop header
LB: loop body
LE: loop exit
PB: predicated region body
PF: predicated region fallthrough
CT: control target
= control target key end

     0   :  { %vm554_vm0 = vcmask 523264   ;;  %s2123_s0 = inlined_call_operand.vmem [shape: bf16[576,128], index: 0, kind: input, shape index: {}]   ;;  %s2124_s1 = inlined_call_operand.vmem [shape: bf16[128,576], index: 1, kind: input, shape index: {}]   ;;  %s2125_s2 = inlined_call_operand.vmem [shape: f32[32,1], index: 2, kind: input, shape index: {}]   ;;  %s2126_s3 = inlined_call_operand.vmem [shape: f32[32,1], index: 3, kind: input, shape index: {}]   ;;  %s2127_s4 = inlined_call_operand.vmem [shape: bf16[128,128], index: 4, kind: output, shape index: {}]  }
   0x1   :  { %v1532_v0 = vld [vmem:[%s2123_s0 + $0x78] sm:$0xff]   ;;  %v1536_v4 = vld [vmem:[%s2123_s0 + $0x70] sm:$0xff]   ;;  %v1540_v8 = vld [vmem:[%s2123_s0 + $0x68] sm:$0xff]  }
   0x2   :  { %v1533_v1 = vld [vmem:[%s2123_s0 + $0xf8] sm:$0xff]   ;;  %1357 = vmatprep.subr.bf16.mxu0 %v1532_v0  ;;  %v1537_v5 = vld [vmem:[%s2123_s0 + $0xf0] sm:$0xff]   ;;  %v1541_v9 = vld [vmem:[%s2123_s0 + $0xe8] sm:$0xff]  }
   0x3   :  { %v1534_v2 = vld [vmem:[%s2123_s0 + $0x38] sm:$0xff]   ;;  %1421 = vmatprep.subr.bf16.mxu1 %v1533_v1  ;;  %v1538_v6 = vld [vmem:[%s2123_s0 + $0x30] sm:$0xff]   ;;  %v1542_v10 = vld [vmem:[%s2123_s0 + $0x28] sm:$0xff]  }
   0x4   :  { %v1535_v3 = vld [vmem:[%s2123_s0 + $0xb8] sm:$0xff]   ;;  %1358 = vmatpush3.bf16.msra.mxu0 %v1534_v2  ;;  %v1539_v7 = vld [vmem:[%s2123_s0 + $0xb0] sm:$0xff]   ;;  %v1543_v11 = vld [vmem:[%s2123_s0 + $0xa8] sm:$0xff]  }
   0x5   :  { %1422 = vmatpush3.bf16.msra.mxu1 %v1535_v3  ;;  %1359 = vmatprep.subr.bf16.mxu0 %v1536_v4  ;;  %v1544_v12 = vld [vmem:[%s2123_s0 + $0x60] sm:$0xff]   ;;  %v1548_v16 = vld [vmem:[%s2123_s0 + $0x58] sm:$0xff]   ;;  %v1552_v20 = vld [vmem:[%s2123_s0 + $0x50] sm:$0xff]  }
   0x6   :  { %1423 = vmatprep.subr.bf16.mxu1 %v1537_v5  ;;  %v1545_v13 = vld [vmem:[%s2123_s0 + $0xe0] sm:$0xff]   ;;  %v1549_v17 = vld [vmem:[%s2123_s0 + $0xd8] sm:$0xff]   ;;  %v1553_v21 = vld [vmem:[%s2123_s0 + $0xd0] sm:$0xff]  }
   0x7   :  { %v1546_v14 = vld [vmem:[%s2123_s0 + $0x20] sm:$0xff]   ;;  %v1550_v18 = vld [vmem:[%s2123_s0 + $0x18] sm:$0xff]   ;;  %v1554_v22 = vld [vmem:[%s2123_s0 + $0x10] sm:$0xff]  }
   0x8   :  { %1360 = vmatpush3.bf16.msra.mxu0 %v1538_v6  ;;  %v1547_v15 = vld [vmem:[%s2123_s0 + $0xa0] sm:$0xff]   ;;  %v1551_v19 = vld [vmem:[%s2123_s0 + $0x98] sm:$0xff]   ;;  %v1555_v23 = vld [vmem:[%s2123_s0 + $0x90] sm:$0xff]  }
   0x9   :  { %1424 = vmatpush3.bf16.msra.mxu1 %v1539_v7  ;;  %1361 = vmatprep.subr.bf16.mxu0 %v1540_v8  ;;  %v1556_v24 = vld [vmem:[%s2123_s0 + $0x48] sm:$0xff]   ;;  %v1560_v28 = vld [vmem:[%s2123_s0 + $0x40] sm:$0xff]   ;;  %v1570_v36 = vld [vmem:[%s2123_s0 + $0x118] sm:$0xff]  }
   0xa   :  { %1425 = vmatprep.subr.bf16.mxu1 %v1541_v9  ;;  %v1557_v25 = vld [vmem:[%s2123_s0 + $0xc8] sm:$0xff]   ;;  %v1561_v29 = vld [vmem:[%s2123_s0 + $0xc0] sm:$0xff]   ;;  %v1583_v42 = vld [vmem:[%s2123_s0 + $0x110] sm:$0xff]  }
   0xb   :  { %v1558_v26 = vld [vmem:[%s2123_s0 + $0x8] sm:$0xff]   ;;  %v1562_v30 = vld [vmem:[%s2123_s0] sm:$0xff]   ;;  %v1579_v43 = vld [vmem:[%s2124_s1 + $0x5c] ss:$20 sps:$4 sm:$0xff]  }
   0xc   :  { %1362 = vmatpush3.bf16.msra.mxu0 %v1542_v10  ;;  %v1559_v27 = vld [vmem:[%s2123_s0 + $0x88] sm:$0xff]   ;;  %v1563_v31 = vld [vmem:[%s2123_s0 + $0x80] sm:$0xff]   ;;  %v1584_v47 = vld [vmem:[%s2124_s1 + $0x7c] ss:$20 sps:$4 sm:$0xff]  }
   0xd   :  { %1426 = vmatpush3.bf16.msra.mxu1 %v1543_v11  ;;  %1363 = vmatprep.subr.bf16.mxu0 %v1544_v12  ;;  %v1564_v32 = vld [vmem:[%s2124_s1] ss:$20 sps:$4 sm:$0xff]   ;;  %v1566_v33 = vld [vmem:[%s2124_s1 + $0x4] ss:$20 sps:$4 sm:$0xff]   ;;  %v1567_v34 = vld [vmem:[%s2124_s1 + $0x8] ss:$20 sps:$4 sm:$0xff]  }
   0xe   :  { %1427 = vmatprep.subr.bf16.mxu1 %v1545_v13  ;;  %v1569_v35 = vld [vmem:[%s2124_s1 + $0xc] ss:$20 sps:$4 sm:$0xff]   ;;  %611 = vmatprep.mubr.bf16.mxu0 %v1566_v33  ;;  %v1573_v38 = vld [vmem:[%s2124_s1 + $0x34] ss:$20 sps:$4 sm:$0xff]   ;;  %v1576_v40 = vld [vmem:[%s2124_s1 + $0x30] ss:$20 sps:$4 sm:$0xff]  }
   0xf   :  { %708 = vmatprep.mubr.bf16.mxu1 %v1569_v35  ;;  %v1571_v37 = vld [vmem:[%s2124_s1 + $0x2c] ss:$20 sps:$4 sm:$0xff]   ;;  %v1575_v39 = vld [vmem:[%s2124_s1 + $0x28] ss:$20 sps:$4 sm:$0xff]   ;;  %v1581_v44 = vld [vmem:[%s2124_s1 + $0x50] ss:$20 sps:$4 sm:$0xff]  }
  0x10   :  { %1364 = vmatpush3.bf16.msra.mxu0 %v1546_v14  ;;  %v1577_v41 = vld [vmem:[%s2124_s1 + $0x54] ss:$20 sps:$4 sm:$0xff]   ;;  %v1582_v45 = vld [vmem:[%s2124_s1 + $0x58] ss:$20 sps:$4 sm:$0xff]   ;;  %v1609_v49 = vld [vmem:[%s2123_s0 + $0x100] sm:$0xff]  }
  0x11   :  { %1428 = vmatpush3.bf16.msra.mxu1 %v1547_v15  ;;  %1365 = vmatprep.subr.bf16.mxu0 %v1548_v16  ;;  %v1596_v46 = vld [vmem:[%s2123_s0 + $0x108] sm:$0xff]   ;;  %v1586_v48 = vld [vmem:[%s2124_s1 + $0x84] ss:$20 sps:$4 sm:$0xff]   ;;  %v1589_v51 = vld [vmem:[%s2124_s1 + $0x80] ss:$20 sps:$4 sm:$0xff]  }
  0x12   :  { %1429 = vmatprep.subr.bf16.mxu1 %v1549_v17  ;;  %v1588_v50 = vld [vmem:[%s2124_s1 + $0x78] ss:$20 sps:$4 sm:$0xff]   ;;  %v1594_v54 = vld [vmem:[%s2124_s1 + $0xa0] ss:$20 sps:$4 sm:$0xff]   ;;  %v1595_v55 = vld [vmem:[%s2124_s1 + $0xa8] ss:$20 sps:$4 sm:$0xff]  }
  0x13   :  { %v1590_v52 = vld [vmem:[%s2124_s1 + $0xa4] ss:$20 sps:$4 sm:$0xff]   ;;  %v1592_v53 = vld [vmem:[%s2124_s1 + $0xac] ss:$20 sps:$4 sm:$0xff]   ;;  %v1599_v57 = vld [vmem:[%s2124_s1 + $0xd4] ss:$20 sps:$4 sm:$0xff]  }
  0x14   :  { %1366 = vmatpush3.bf16.msra.mxu0 %v1550_v18  ;;  %v1597_v56 = vld [vmem:[%s2124_s1 + $0xcc] ss:$20 sps:$4 sm:$0xff]   ;;  %v1601_v58 = vld [vmem:[%s2124_s1 + $0xc8] ss:$20 sps:$4 sm:$0xff]   ;;  %v1602_v59 = vld [vmem:[%s2124_s1 + $0xd0] ss:$20 sps:$4 sm:$0xff]  }
  0x15   :  { %1430 = vmatpush3.bf16.msra.mxu1 %v1551_v19  ;;  %1367 = vmatprep.subr.bf16.mxu0 %v1552_v20  ;;  %v1603_v60 = vld [vmem:[%s2124_s1 + $0xf4] ss:$20 sps:$4 sm:$0xff]   ;;  %v1605_v61 = vld [vmem:[%s2124_s1 + $0xfc] ss:$20 sps:$4 sm:$0xff]   ;;  %v1608_v63 = vld [vmem:[%s2124_s1 + $0xf8] ss:$20 sps:$4 sm:$0xff]  }
  0x16   :  { %1431 = vmatprep.subr.bf16.mxu1 %v1553_v21  ;;  %v1607_v62 = vld [vmem:[%s2124_s1 + $0xf0] ss:$20 sps:$4 sm:$0xff]   ;;  %v1614_v2 = vld [vmem:[%s2124_s1 + $0x118] ss:$20 sps:$4 sm:$0xff]   ;;  %v1615_v3 = vld [vmem:[%s2124_s1 + $0x120] ss:$20 sps:$4 sm:$0xff]  }
  0x17   :  { %v1610_v0 = vld [vmem:[%s2124_s1 + $0x11c] ss:$20 sps:$4 sm:$0xff]   ;;  %v1612_v1 = vld [vmem:[%s2124_s1 + $0x124] ss:$20 sps:$4 sm:$0xff]   ;;  %v1620_v8 = vld [vmem:[%s2124_s1 + $0x60] ss:$20 sps:$4 sm:$0xff]  }
  0x18   :  { %1368 = vmatpush3.bf16.msra.mxu0 %v1554_v22  ;;  %v1616_v4 = vld [vmem:[%s2124_s1 + $0x10] ss:$20 sps:$4 sm:$0xff]   ;;  %v1618_v6 = vld [vmem:[%s2124_s1 + $0x38] ss:$20 sps:$4 sm:$0xff]   ;;  %v1621_v9 = vld [vmem:[%s2124_s1 + $0x100] ss:$20 sps:$4 sm:$0xff]  }
  0x19   :  { %1432 = vmatpush3.bf16.msra.mxu1 %v1555_v23  ;;  %1369 = vmatprep.subr.bf16.mxu0 %v1556_v24  ;;  %v1617_v5 = vld [vmem:[%s2124_s1 + $0xb0] ss:$20 sps:$4 sm:$0xff]   ;;  %v1619_v7 = vld [vmem:[%s2124_s1 + $0xd8] ss:$20 sps:$4 sm:$0xff]   ;;  %v1622_v10 = vld [vmem:[%s2124_s1 + $0x88] ss:$20 sps:$4 sm:$0xff]  }
  0x1a   :  { %1433 = vmatprep.subr.bf16.mxu1 %v1557_v25  ;;  %v1623_v11 = vld [vmem:[%s2124_s1 + $0x128] ss:$20 sps:$4 sm:$0xff]  }
  0x1c   :  { %1370 = vmatpush3.bf16.msra.mxu0 %v1558_v26 }
  0x1d   :  { %1434 = vmatpush3.bf16.msra.mxu1 %v1559_v27  ;;  %1371 = vmatprep.subr.bf16.mxu0 %v1560_v28 }
  0x1e   :  { %1435 = vmatprep.subr.bf16.mxu1 %v1561_v29 }
  0x20   :  { %1372 = vmatpush3.bf16.msra.mxu0 %v1562_v30 }
  0x21   :  { %1436 = vmatpush3.bf16.msra.mxu1 %v1563_v31  ;;  %1497 = vmatprep.subr.bf16.mxu0 %v1570_v36 }
  0x22   :  { %1521 = vmatprep.subr.bf16.mxu1 %v1570_v36 }
  0x23   :  { %612 = vmatmul.mubr.bf16.vlgmr.msra.gmra.mxu0 %v1564_v32 }
  0x24   :  { %709 = vmatmul.mubr.bf16.vlgmr.msra.gmra.mxu1 %v1567_v34  ;;  %1498 = vmatpush3.bf16.msra.mxu0 %v1570_v36 }
  0x25   :  { %1525 = vmatpush3.bf16.msra.mxu1 %v1570_v36  ;;  %619 = vmatprep.mubr.bf16.mxu0 %v1571_v37 }
  0x26   :  { %716 = vmatprep.mubr.bf16.mxu1 %v1573_v38  ;;  %1522 = vmatprep.subr.bf16.mxu1 %v1583_v42 }
  0x27   :  { %1499 = vmatprep.subr.bf16.mxu0 %v1583_v42 }
  0x28   :  { %1500 = vmatpush3.bf16.msra.mxu0 %v1583_v42 }
  0x29   :  { %1526 = vmatpush3.bf16.msra.mxu1 %v1583_v42  ;;  %1501 = vmatprep.subr.bf16.mxu0 %v1596_v46 }
  0x2a   :  { %1523 = vmatprep.subr.bf16.mxu1 %v1596_v46 }
  0x2b   :  { %620 = vmatmul.mubr.bf16.gmra.mxu0 %v1575_v39 }
  0x2c   :  { %717 = vmatmul.mubr.bf16.gmra.mxu1 %v1576_v40  ;;  %627 = vmatprep.mubr.bf16.mxu0 %v1577_v41 }
  0x2d   :  { %724 = vmatprep.mubr.bf16.mxu1 %v1579_v43  ;;  %1527 = vmatpush3.bf16.msra.mxu1 %v1596_v46 }
  0x2e   :  { %1502 = vmatpush3.bf16.msra.mxu0 %v1596_v46  ;;  %1524 = vmatprep.subr.bf16.mxu1 %v1609_v49 }
  0x2f   :  { %1503 = vmatprep.subr.bf16.mxu0 %v1609_v49 }
  0x31   :  { %1528 = vmatpush3.bf16.msra.mxu1 %v1609_v49 }
  0x32   :  { %1504 = vmatpush3.bf16.msra.mxu0 %v1609_v49 }
  0x33   :  { %628 = vmatmul.mubr.bf16.gmra.mxu0 %v1581_v44 }
  0x34   :  { %725 = vmatmul.mubr.bf16.gmra.mxu1 %v1582_v45  ;;  %635 = vmatprep.mubr.bf16.mxu0 %v1584_v47 }
  0x35   :  { %732 = vmatprep.mubr.bf16.mxu1 %v1586_v48 }
  0x3b   :  { %636 = vmatmul.mubr.bf16.gmra.mxu0 %v1588_v50 }
  0x3c   :  { %733 = vmatmul.mubr.bf16.gmra.mxu1 %v1589_v51  ;;  %643 = vmatprep.mubr.bf16.mxu0 %v1590_v52 }
  0x3d   :  { %740 = vmatprep.mubr.bf16.mxu1 %v1592_v53 }
  0x43   :  { %644 = vmatmul.mubr.bf16.gmra.mxu0 %v1594_v54 }
  0x44   :  { %741 = vmatmul.mubr.bf16.gmra.mxu1 %v1595_v55  ;;  %651 = vmatprep.mubr.bf16.mxu0 %v1597_v56 }
  0x45   :  { %748 = vmatprep.mubr.bf16.mxu1 %v1599_v57 }
  0x4b   :  { %652 = vmatmul.mubr.bf16.gmra.mxu0 %v1601_v58 }
  0x4c   :  { %749 = vmatmul.mubr.bf16.gmra.mxu1 %v1602_v59  ;;  %659 = vmatprep.mubr.bf16.mxu0 %v1603_v60 }
  0x4d   :  { %756 = vmatprep.mubr.bf16.mxu1 %v1605_v61 }
  0x53   :  { %660 = vmatmul.mubr.bf16.gmra.mxu0 %v1607_v62 }
  0x54   :  { %757 = vmatmul.mubr.bf16.gmra.mxu1 %v1608_v63  ;;  %667 = vmatprep.mubr.bf16.mxu0 %v1610_v0 }
  0x55   :  { %764 = vmatprep.mubr.bf16.mxu1 %v1612_v1 }
  0x5b   :  { %668 = vmatmul.mubr.bf16.gmra.mxu0 %v1614_v2 }
  0x5c   :  { %765 = vmatmul.mubr.bf16.gmra.mxu1 %v1615_v3  ;;  %1505 = vmatprep.mubr.msk.bf16.mxu0 %vm554_vm0, %v1616_v4 }
  0x5d   :  { %1513 = vmatprep.mubr.msk.bf16.mxu1 %vm554_vm0, %v1617_v5 }
  0x63   :  { %1506 = vmatmul.mubr.msk.bf16.vlgmr.msra.gmra.mxu0 %vm554_vm0, %v1618_v6 }
  0x64   :  { %1514 = vmatmul.mubr.msk.bf16.vlgmr.msra.gmra.mxu1 %vm554_vm0, %v1619_v7  ;;  %1509 = vmatprep.mubr.msk.bf16.mxu0 %vm554_vm0, %v1620_v8 }
  0x65   :  { %1517 = vmatprep.mubr.msk.bf16.mxu1 %vm554_vm0, %v1621_v9 }
  0x6b   :  { %1510 = vmatmul.mubr.msk.bf16.gmra.mxu0 %vm554_vm0, %v1622_v10 }
  0x6c   :  { %1518 = vmatmul.mubr.msk.bf16.gmra.mxu1 %vm554_vm0, %v1623_v11 }
  0xe3   :  { %v1373_v12 = vpop.f32.mrf.mxu0 }
  0xe4   :  { %v1437_v13 = vpop.f32.mrf.mxu1 }
  0xe5   :  { %v1374_v14 = vpop.f32.mrf.mxu0 }
  0xe6   :  { %v1375_v15 = vadd.f32 %v1374_v14, %v1373_v12  ;;  %v1438_v16 = vpop.f32.mrf.mxu1 }
  0xe7   :  { %v1439_v17 = vadd.f32 %v1438_v16, %v1437_v13  ;;  %v1376_v18 = vpop.f32.mrf.mxu0 }
  0xe8   :  { %v1440_v19 = vpop.f32.mrf.mxu1 }
  0xe9   :  { %v1377_v20 = vpop.f32.mrf.mxu0  ;;  %v1894_v21 = vadd.f32 %v1439_v17, %v1375_v15 }
  0xea   :  { %v1378_v22 = vadd.f32 %v1377_v20, %v1376_v18  ;;  %v1441_v23 = vpop.f32.mrf.mxu1 }
  0xeb   :  { %v1442_v24 = vadd.f32 %v1441_v23, %v1440_v19  ;;  %v1379_v25 = vpop.f32.mrf.mxu0 }
  0xec   :  { %v1443_v26 = vpop.f32.mrf.mxu1 }
  0xed   :  { %v1380_v27 = vpop.f32.mrf.mxu0  ;;  %v1896_v28 = vadd.f32 %v1442_v24, %v1378_v22 }
  0xee   :  { %v1444_v29 = vpop.f32.mrf.mxu1  ;;  %v1381_v23 = vadd.f32 %v1380_v27, %v1379_v25 }
  0xef   :  { %v1898_v30 = vpop.f32.mrf.mxu0  ;;  %v1445_v24 = vadd.f32 %v1444_v29, %v1443_v26 }
  0xf0   :  { %v1900_v31 = vpop.f32.mrf.mxu1 }
  0xf1   :  { %v1383_v32 = vpop.f32.mrf.mxu0 }
  0xf2   :  { %v1447_v33 = vpop.f32.mrf.mxu1 }
  0xf3   :  { %v1385_v34 = vpop.f32.mrf.mxu0 }
  0xf4   :  { %v1449_v35 = vpop.f32.mrf.mxu1 }
  0xf5   :  { %v1386_v36 = vpop.f32.mrf.mxu0 }
  0xf6   :  { %v1387_v37 = vadd.f32 %v1386_v36, %v1385_v34  ;;  %v1450_v38 = vpop.f32.mrf.mxu1 }
  0xf7   :  { %v1451_v39 = vadd.f32 %v1450_v38, %v1449_v35  ;;  %v1388_v40 = vpop.f32.mrf.mxu0 }
  0xf8   :  { %v1452_v41 = vpop.f32.mrf.mxu1 }
  0xf9   :  { %v1389_v42 = vpop.f32.mrf.mxu0  ;;  %v1902_v43 = vadd.f32 %v1451_v39, %v1387_v37 }
  0xfa   :  { %v1390_v44 = vadd.f32 %v1389_v42, %v1388_v40  ;;  %v1453_v45 = vpop.f32.mrf.mxu1  ;;  %v1384_v40 = vadd.f32 %v1383_v32, %v1898_v30 }
  0xfb   :  { %v1454_v46 = vadd.f32 %v1453_v45, %v1452_v41  ;;  %v1391_v47 = vpop.f32.mrf.mxu0  ;;  %v1448_v41 = vadd.f32 %v1447_v33, %v1900_v31 }
  0xfc   :  { %v1455_v48 = vpop.f32.mrf.mxu1 }
  0xfd   :  { %v1392_v49 = vpop.f32.mrf.mxu0  ;;  %v1904_v50 = vadd.f32 %v1454_v46, %v1390_v44  ;;  %v719_v44 = vadd.f32 %v1445_v24, %v1381_v23 }
  0xfe   :  { %v1393_v51 = vadd.f32 %v1392_v49, %v1391_v47  ;;  %v1456_v52 = vpop.f32.mrf.mxu1 }
  0xff   :  { %v1457_v53 = vadd.f32 %v1456_v52, %v1455_v48  ;;  %v1906_v54 = vpop.f32.mrf.mxu0 }
 0x100   :  { %v1908_v55 = vpop.f32.mrf.mxu1 }
 0x101   :  { %v1910_v56 = vpop.f32.mrf.mxu0  ;;  %v1912_v57 = vadd.f32 %v1457_v53, %v1393_v51  ;;  %v722_v51 = vadd.f32 %v1448_v41, %v1384_v40 }
 0x102   :  { %v1914_v58 = vpop.f32.mrf.mxu1 }
 0x103   :  { %v1397_v59 = vpop.f32.mrf.mxu0  ;;  %v1460_v40 = vadd.f32 %v1914_v58, %v1908_v55 }
 0x104   :  { %v1461_v60 = vpop.f32.mrf.mxu1 }
 0x105   :  { %v1398_v61 = vpop.f32.mrf.mxu0 }
 0x106   :  { %v1462_v62 = vpop.f32.mrf.mxu1  ;;  %v1399_v52 = vadd.f32 %v1398_v61, %v1397_v59 }
 0x107   :  { %v1400_v63 = vpop.f32.mrf.mxu0  ;;  %v1463_v30 = vadd.f32 %v1462_v62, %v1461_v60 }
 0x108   :  { %v1464_v0 = vpop.f32.mrf.mxu1 }
 0x109   :  { %v1401_v1 = vpop.f32.mrf.mxu0 }
 0x10a   :  { %v1465_v2 = vpop.f32.mrf.mxu1 }
 0x10b   :  { %v1403_v3 = vpop.f32.mrf.mxu0 }
 0x10c   :  { %v1467_v4 = vpop.f32.mrf.mxu1 }
 0x10d   :  { %v1404_v5 = vpop.f32.mrf.mxu0 }
 0x10e   :  { %v1468_v6 = vpop.f32.mrf.mxu1  ;;  %v1405_v35 = vadd.f32 %v1404_v5, %v1403_v3  ;;  %v1402_v3 = vadd.f32 %v1401_v1, %v1400_v63 }
 0x10f   :  { %v1406_v7 = vpop.f32.mrf.mxu0  ;;  %v1469_v36 = vadd.f32 %v1468_v6, %v1467_v4  ;;  %v1466_v4 = vadd.f32 %v1465_v2, %v1464_v0  ;;  %v743_v6 = vadd.f32 %v1463_v30, %v1399_v52 }
 0x110   :  { %v1470_v8 = vpop.f32.mrf.mxu1 }
 0x111   :  { %v1407_v9 = vpop.f32.mrf.mxu0  ;;  %v751_v46 = vadd.f32 %v1469_v36, %v1405_v35  ;;  %v746_v61 = vadd.f32 %v1466_v4, %v1402_v3 }
 0x112   :  { %v1471_v10 = vpop.f32.mrf.mxu1  ;;  %v1408_v29 = vadd.f32 %v1407_v9, %v1406_v7 }
 0x113   :  { %v1916_v11 = vpop.f32.mrf.mxu0  ;;  %v1472_v48 = vadd.f32 %v1471_v10, %v1470_v8 }
 0x114   :  { %v1918_v12 = vpop.f32.mrf.mxu1 }
 0x115   :  { %v1920_v13 = vpop.f32.mrf.mxu0  ;;  %v754_v5 = vadd.f32 %v1472_v48, %v1408_v29 }
 0x116   :  { %v1922_v14 = vpop.f32.mrf.mxu1 }
 0x117   :  { %v1924_v15 = vpop.f32.mrf.mxu0 }
 0x118   :  { %v1926_v16 = vpop.f32.mrf.mxu1 }
 0x119   :  { %v1928_v17 = vpop.f32.mrf.mxu0 }
 0x11a   :  { %v1930_v18 = vpop.f32.mrf.mxu1 }
 0x11b   :  { %v1932_v19 = vpop.f32.mrf.mxu0 }
 0x11c   :  { %v1934_v20 = vpop.f32.mrf.mxu1 }
 0x11d   :  { %v1936_v22 = vpop.f32.mrf.mxu0 }
 0x11e   :  { %v1938_v34 = vpop.f32.mrf.mxu1  ;;  %v1417_v29 = vadd.f32 %v1936_v22, %v1932_v19 }
 0x11f   :  { %v1940_v37 = vpop.f32.mrf.mxu0 }
 0x120   :  { %v1942_v38 = vpop.f32.mrf.mxu1 }
 0x121   :  { %v1419_v39 = vpop.f32.mrf.mxu0 }
 0x122   :  { %v1483_v42 = vpop.f32.mrf.mxu1 }
 0x123   :  { %v1507_v45 = vpop.f32.mrf.mxu0 }
 0x124   :  { %v1946_v47 = vadd.f32 %v1507_v45, %v719_v44  ;;  %v1515_v25 = vpop.f32.mrf.mxu1 }
 0x125   :  { %v1948_v26 = vadd.f32 %v1515_v25, %v751_v46  ;;  %v807_v27 = vpop.f32.mrf.mxu0  ;;  %v1420_v46 = vadd.f32 %v1419_v39, %v1940_v37  ;;  %v1484_v25 = vadd.f32 %v1483_v42, %v1942_v38  ;;  %v1478_v39 = vadd.f32 %v1930_v18, %v1926_v16 }
 0x126   :  { %v839_v49 = vpop.f32.mrf.mxu1  ;;  %874 = vadd.xlane.f32.xlu1 %v1946_v47  ;;  %v1955_v33 = vadd.f32 %v807_v27, %v1894_v21  ;;  %v904_v62 = vmul.f32 %v1946_v47, %v1946_v47  ;;  %v1411_v42 = vadd.f32 %v1920_v13, %v1916_v11 }
 0x127   :  { %890 = vadd.xlane.f32.xlu0 %v1948_v26  ;;  %v1508_v31 = vpop.f32.mrf.mxu0  ;;  %v1961_v59 = vadd.f32 %v839_v49, %v743_v6  ;;  %v912_v1 = vmul.f32 %v1948_v26, %v1948_v26  ;;  %v770_v48 = vadd.f32 %v1484_v25, %v1420_v46  ;;  %v1475_v49 = vadd.f32 %v1922_v14, %v1918_v12 }
 0x128   :  { %v1952_v32 = vadd.f32 %v1508_v31, %v722_v51  ;;  %v1516_v53 = vpop.f32.mrf.mxu1  ;;  %v902_v10 = vmul.f32 %v1955_v33, %v1955_v33  ;;  %v1632_v31 = vmov 0  }
 0x129   :  { %v1959_v7 = vadd.f32 %v1516_v53, %v754_v5  ;;  %v810_v0 = vpop.f32.mrf.mxu0  ;;  %v910_v36 = vmul.f32 %v1961_v59, %v1961_v59  ;;  %v759_v16 = vadd.f32 %v1475_v49, %v1411_v42  ;;  %1530 = vset.pattern.permute.xlu0 %v1632_v31  ;;  %1531 = vset.pattern.permute.xlu1 %v1632_v31 }
 0x12a   :  { %876 = vadd.xlane.f32.xlu1 %v1952_v32  ;;  %v842_v60 = vpop.f32.mrf.mxu1  ;;  %v905_v63 = vmul.f32 %v1952_v32, %v1952_v32  ;;  %v1975_v2 = vadd.f32 %v810_v0, %v1896_v28  ;;  %v1396_v28 = vadd.f32 %v1910_v56, %v1906_v54  ;;  %v1481_v54 = vadd.f32 %v1938_v34, %v1934_v20 }
 0x12b   :  { %870 = vadd.xlane.f32.xlu0 %v1955_v33  ;;  %v1965_v21 = vadd.f32 %v842_v60, %v746_v61  ;;  %v913_v8 = vmul.f32 %v1959_v7, %v1959_v7  ;;  %v1511_v9 = vpop.f32.mrf.mxu0  ;;  %v1414_v34 = vadd.f32 %v1928_v17, %v1924_v15 }
 0x12c   :  { %v903_v23 = vmul.f32 %v1975_v2, %v1975_v2  ;;  %v1519_v24 = vpop.f32.mrf.mxu1  ;;  %v738_v27 = vadd.f32 %v1460_v40, %v1396_v28  ;;  %v2001_v56 = vadd.f32 %v1511_v9, %v1912_v57  ;;  %v767_v37 = vadd.f32 %v1481_v54, %v1417_v29 }
 0x12d   :  { %v823_v35 = vpop.f32.mrf.mxu0  ;;  %v911_v41 = vmul.f32 %v1965_v21, %v1965_v21  ;;  %v762_v17 = vadd.f32 %v1478_v39, %v1414_v34 }
 0x12e   :  { %892 = vadd.xlane.f32.xlu1 %v1959_v7  ;;  %v855_v44 = vpop.f32.mrf.mxu1  ;;  %v2007_v19 = vadd.f32 %v1519_v24, %v767_v37  ;;  %v2015_v57 = vadd.f32 %v823_v35, %v1902_v43  ;;  %v908_v15 = vmul.f32 %v2001_v56, %v2001_v56 }
 0x12f   :  { %886 = vadd.xlane.f32.xlu0 %v1961_v59  ;;  %v1512_v45 = vpop.f32.mrf.mxu0  ;;  %v2033_v51 = vadd.f32 %v855_v44, %v759_v16 }
 0x130   :  { %v1998_v55 = vadd.f32 %v1512_v45, %v738_v27  ;;  %v1520_v58 = vpop.f32.mrf.mxu1  ;;  %v906_v12 = vmul.f32 %v2015_v57, %v2015_v57  ;;  %v916_v30 = vmul.f32 %v2007_v19, %v2007_v19 }
 0x131   :  { %v2005_v38 = vadd.f32 %v1520_v58, %v770_v48  ;;  %v826_v22 = vpop.f32.mrf.mxu0  ;;  %v914_v14 = vmul.f32 %v2033_v51, %v2033_v51 }
 0x132   :  { %888 = vadd.xlane.f32.xlu1 %v1965_v21  ;;  %v2012_v20 = vadd.f32 %v826_v22, %v1904_v50  ;;  %v909_v43 = vmul.f32 %v1998_v55, %v1998_v55  ;;  %v858_v50 = vpop.f32.mrf.mxu1 }
 0x133   :  { %922 = vadd.xlane.f32.xlu0 %v904_v62  ;;  %v2031_v18 = vadd.f32 %v858_v50, %v762_v17  ;;  %v917_v52 = vmul.f32 %v2005_v38, %v2005_v38 }
 0x134   :  { %v907_v11 = vmul.f32 %v2012_v20, %v2012_v20 }
 0x135   :  { %v915_v13 = vmul.f32 %v2031_v18, %v2031_v18 }
 0x136   :  { %924 = vadd.xlane.f32.xlu1 %v905_v63 }
 0x137   :  { %938 = vadd.xlane.f32.xlu0 %v912_v1 }
 0x13a   :  { %940 = vadd.xlane.f32.xlu1 %v913_v8 }
 0x13b   :  { %918 = vadd.xlane.f32.xlu0 %v902_v10 }
 0x13e   :  { %920 = vadd.xlane.f32.xlu1 %v903_v23 }
 0x13f   :  { %934 = vadd.xlane.f32.xlu0 %v910_v36 }
 0x142   :  { %936 = vadd.xlane.f32.xlu1 %v911_v41 }
 0x143   :  { %872 = vadd.xlane.f32.xlu0 %v1975_v2 }
 0x146   :  { %884 = vadd.xlane.f32.xlu1 %v1998_v55 }
 0x147   :  { %882 = vadd.xlane.f32.xlu0 %v2001_v56 }
 0x14a   :  { %900 = vadd.xlane.f32.xlu1 %v2005_v38 }
 0x14b   :  { %898 = vadd.xlane.f32.xlu0 %v2007_v19 }
 0x14e   :  { %880 = vadd.xlane.f32.xlu1 %v2012_v20 }
 0x14f   :  { %878 = vadd.xlane.f32.xlu0 %v2015_v57 }
 0x152   :  { %932 = vadd.xlane.f32.xlu1 %v909_v43 }
 0x153   :  { %930 = vadd.xlane.f32.xlu0 %v908_v15 }
 0x156   :  { %896 = vadd.xlane.f32.xlu1 %v2031_v18 }
 0x157   :  { %894 = vadd.xlane.f32.xlu0 %v2033_v51 }
 0x15a   :  { %928 = vadd.xlane.f32.xlu1 %v907_v11 }
 0x15b   :  { %926 = vadd.xlane.f32.xlu0 %v906_v12 }
 0x15e   :  { %944 = vadd.xlane.f32.xlu1 %v915_v13 }
 0x15f   :  { %942 = vadd.xlane.f32.xlu0 %v914_v14 }
 0x162   :  { %948 = vadd.xlane.f32.xlu1 %v917_v52 }
 0x163   :  { %946 = vadd.xlane.f32.xlu0 %v916_v30 }
 0x1af   :  { %v875_v53 = vpop.xlane.xlu1 %874 }
 0x1b0   :  { %v891_v3 = vpop.xlane.xlu0 %890 }
 0x1b3   :  { %v877_v4 = vpop.xlane.xlu1 %876 }
 0x1b4   :  { %v871_v5 = vpop.xlane.xlu0 %870 }
 0x1b7   :  { %v893_v6 = vpop.xlane.xlu1 %892 }
 0x1b8   :  { %v887_v60 = vpop.xlane.xlu0 %886 }
 0x1bb   :  { %v889_v61 = vpop.xlane.xlu1 %888 }
 0x1bc   :  { %v923_v62 = vpop.xlane.xlu0 %922 }
 0x1bf   :  { %v925_v63 = vpop.xlane.xlu1 %924 }
 0x1c0   :  { %v939_v0 = vpop.xlane.xlu0 %938 }
 0x1c3   :  { %v941_v1 = vpop.xlane.xlu1 %940 }
 0x1c4   :  { %v919_v8 = vpop.xlane.xlu0 %918 }
 0x1c7   :  { %v921_v9 = vpop.xlane.xlu1 %920 }
 0x1c8   :  { %v935_v10 = vpop.xlane.xlu0 %934 }
 0x1cb   :  { %v937_v23 = vpop.xlane.xlu1 %936 }
 0x1cc   :  { %v873_v24 = vpop.xlane.xlu0 %872 }
 0x1cf   :  { %v885_v35 = vpop.xlane.xlu1 %884 }
 0x1d0   :  { %v883_v36 = vpop.xlane.xlu0 %882  ;;  %v953_v27 = vadd.f32 %v885_v35, %v877_v4 }
 0x1d1   :  { %v952_v29 = vadd.f32 %v883_v36, %v875_v53 }
 0x1d2   :  { %v957_v37 = vadd.f32 %v953_v27, %v893_v6 }
 0x1d3   :  { %v901_v28 = vpop.xlane.xlu1 %900  ;;  %v956_v22 = vadd.f32 %v952_v29, %v891_v3 }
 0x1d4   :  { %v899_v40 = vpop.xlane.xlu0 %898  ;;  %v961_v15 = vadd.f32 %v957_v37, %v901_v28 }
 0x1d5   :  { %v960_v17 = vadd.f32 %v956_v22, %v899_v40 }
 0x1d6   :  { %v2051_v4 = vmul.f32 0.0078125, %v961_v15 }
 0x1d7   :  { %v881_v41 = vpop.xlane.xlu1 %880  ;;  %v976_v3 = vmul.f32 0.0078125, %v960_v17  ;;  %v997_v17 = vld [vmem:[%s2125_s2 + $0x18] sm:$0xff] }
 0x1d8   :  { %v879_v44 = vpop.xlane.xlu0 %878  ;;  %v951_v49 = vadd.f32 %v881_v41, %v873_v24 }
 0x1d9   :  { %v950_v25 = vadd.f32 %v879_v44, %v871_v5  ;;  %v984_v28 = vmul.f32 %v976_v3, %v976_v3 }
 0x1da   :  { %v955_v30 = vadd.f32 %v951_v49, %v889_v61  ;;  %v985_v61 = vmul.f32 %v2051_v4, %v2051_v4  ;;  %v996_v49 = vld [vmem:[%s2125_s2 + $0x10] sm:$0xff] }
 0x1db   :  { %v933_v45 = vpop.xlane.xlu1 %932  ;;  %v954_v48 = vadd.f32 %v950_v25, %v887_v60 }
 0x1dc   :  { %v931_v46 = vpop.xlane.xlu0 %930  ;;  %v965_v16 = vadd.f32 %v933_v45, %v925_v63 }
 0x1dd   :  { %v964_v11 = vadd.f32 %v931_v46, %v923_v62 }
 0x1de   :  { %v969_v5 = vadd.f32 %v965_v16, %v941_v1 }
 0x1df   :  { %v897_v54 = vpop.xlane.xlu1 %896  ;;  %v968_v63 = vadd.f32 %v964_v11, %v939_v0 }
 0x1e0   :  { %v895_v58 = vpop.xlane.xlu0 %894  ;;  %v959_v6 = vadd.f32 %v955_v30, %v897_v54  ;;  %v995_v30 = vld [vmem:[%s2125_s2 + $0x8] sm:$0xff] }
 0x1e1   :  { %v958_v34 = vadd.f32 %v954_v48, %v895_v58 }
 0x1e2   :  { %v975_v40 = vmul.f32 0.0078125, %v959_v6 }
 0x1e3   :  { %v929_v39 = vpop.xlane.xlu1 %928  ;;  %v2049_v12 = vmul.f32 0.0078125, %v958_v34  ;;  %v994_v34 = vld [vmem:[%s2125_s2] sm:$0xff] }
 0x1e4   :  { %v927_v42 = vpop.xlane.xlu0 %926  ;;  %v963_v43 = vadd.f32 %v929_v39, %v921_v9  ;;  %v983_v29 = vmul.f32 %v975_v40, %v975_v40 }
 0x1e5   :  { %v962_v50 = vadd.f32 %v927_v42, %v919_v8  ;;  %v982_v60 = vmul.f32 %v2049_v12, %v2049_v12 }
 0x1e6   :  { %v967_v31 = vadd.f32 %v963_v43, %v937_v23 }
 0x1e7   :  { %v945_v13 = vpop.xlane.xlu1 %944  ;;  %v966_v14 = vadd.f32 %v962_v50, %v935_v10 }
 0x1e8   :  { %v943_v52 = vpop.xlane.xlu0 %942  ;;  %v971_v35 = vadd.f32 %v967_v31, %v945_v13  ;;  %v1012_v13 = vld [vmem:[%s2126_s3 + $0x10] sm:$0xff] }
 0x1e9   :  { %v970_v53 = vadd.f32 %v966_v14, %v943_v52 }
 0x1ea   :  { %v979_v45 = vmul.f32 0.0078125, %v971_v35 }
 0x1eb   :  { %v978_v8 = vmul.f32 0.0078125, %v970_v53  ;;  %v949_v9 = vpop.xlane.xlu1 %948 }
 0x1ec   :  { %v973_v62 = vadd.f32 %v969_v5, %v949_v9  ;;  %v947_v24 = vpop.xlane.xlu0 %946  ;;  %v987_v54 = vsub.f32 %v979_v45, %v983_v29  ;;  %v1010_v5 = vld [vmem:[%s2126_s3] sm:$0xff] }
 0x1ed   :  { %v986_v36 = vsub.f32 %v978_v8, %v982_v60  ;;  %v972_v10 = vadd.f32 %v968_v63, %v947_v24  ;;  %v1011_v60 = vld [vmem:[%s2126_s3 + $0x8] sm:$0xff]  ;;  %v1013_v63 = vld [vmem:[%s2126_s3 + $0x18] sm:$0xff] }
 0x1ee   :  { %v981_v23 = vmul.f32 0.0078125, %v973_v62  ;;  %v991_v37 = vmax.f32 %v987_v54, 0.0 }
 0x1ef   :  { %v990_v41 = vmax.f32 %v986_v36, 0.0  ;;  %v980_v1 = vmul.f32 0.0078125, %v972_v10 }
 0x1f0   :  { %v989_v44 = vsub.f32 %v981_v23, %v985_v61  ;;  %v999_v22 = vadd.f32 1e-05, %v991_v37 }
 0x1f1   :  { %v998_v46 = vadd.f32 1e-05, %v990_v41  ;;  %v988_v25 = vsub.f32 %v980_v1, %v984_v28 }
 0x1f2   :  { %v993_v27 = vmax.f32 %v989_v44, 0.0 }
 0x1f3   :  { %1624 = vrsqrt.f32 %v998_v46  ;;  %v992_v0 = vmax.f32 %v988_v25, 0.0 }
 0x1f4   :  { %v1001_v58 = vadd.f32 1e-05, %v993_v27 }
 0x1f5   :  { %v1000_v48 = vadd.f32 1e-05, %v992_v0 }
 0x1f7   :  { %1626 = vrsqrt.f32 %v1000_v48 }
 0x1f8   :  { %1628 = vrsqrt.f32 %v1001_v58 }
 0x1f9   :  { %1630 = vrsqrt.f32 %v999_v22 }
 0x200   :  { %v1625_v39 = vpop.eup %1624 }
 0x201   :  { %v1006_v42 = vmul.f32 %v1625_v39, %v994_v34 }
 0x203   :  { %1024 = vperm.xlu0 %1530, %v1006_v42   ;;  %v1014_v53 = vmul.f32 %v1006_v42, %v2049_v12 }
 0x204   :  { %v1627_v43 = vpop.eup %1626 }
 0x205   :  { %v1008_v50 = vmul.f32 %v1627_v43, %v996_v49  ;;  %v1629_v15 = vpop.eup %1628 }
 0x206   :  { %v1009_v16 = vmul.f32 %v1629_v15, %v997_v17  ;;  %v1631_v52 = vpop.eup %1630 }
 0x207   :  { %1034 = vperm.xlu1 %1531, %v1008_v50   ;;  %v1016_v11 = vmul.f32 %v1008_v50, %v976_v3  ;;  %v1007_v31 = vmul.f32 %v1631_v52, %v995_v30  ;;  %v1018_v3 = vsub.f32 %v1010_v5, %v1014_v53 }
 0x208   :  { %v1017_v9 = vmul.f32 %v1009_v16, %v2051_v4 }
 0x209   :  { %v1020_v14 = vsub.f32 %v1012_v13, %v1016_v11  ;;  %v1015_v6 = vmul.f32 %v1007_v31, %v975_v40 }
 0x20a   :  { %v1021_v12 = vsub.f32 %v1013_v63, %v1017_v9 }
 0x20b   :  { %1039 = vperm.xlu1 %1531, %v1009_v16   ;;  %v1019_v8 = vsub.f32 %v1011_v60, %v1015_v6 }
 0x20f   :  { %1058 = vperm.xlu1 %1531, %v1020_v14  }
 0x213   :  { %1029 = vperm.xlu1 %1531, %v1007_v31  }
 0x217   :  { %1048 = vperm.xlu1 %1531, %v1018_v3  }
 0x21b   :  { %1053 = vperm.xlu1 %1531, %v1019_v8  }
 0x21f   :  { %1063 = vperm.xlu1 %1531, %v1021_v12  }
 0x27e   :  { %v1025_v10 = vpop.permute.xlu0 %1024 }
 0x27f   :  { %v1042_v61 = vmul.f32 %v1025_v10, %v1955_v33  ;;  %v1094_v23 = vmul.f32 %v1025_v10, %v2015_v57  ;;  %v1126_v28 = vmul.f32 %v1025_v10, %v1961_v59  ;;  %v1158_v4 = vmul.f32 %v1025_v10, %v2033_v51 }
 0x282   :  { %v1035_v62 = vpop.permute.xlu1 %1034 }
 0x283   :  { %v1044_v41 = vmul.f32 %v1035_v62, %v1946_v47  ;;  %v1096_v1 = vmul.f32 %v1035_v62, %v2001_v56  ;;  %v1128_v44 = vmul.f32 %v1035_v62, %v1948_v26  ;;  %v1160_v45 = vmul.f32 %v1035_v62, %v2007_v19 }
 0x286   :  { %v1040_v24 = vpop.permute.xlu1 %1039 }
 0x287   :  { %v1129_v50 = vmul.f32 %v1040_v24, %v1959_v7  ;;  %v1161_v15 = vmul.f32 %v1040_v24, %v2005_v38 }
 0x28a   :  { %v1059_v35 = vpop.permute.xlu1 %1058 }
 0x28b   :  { %v1068_v0 = vadd.f32 %v1059_v35, %v1044_v41  ;;  %v1100_v47 = vadd.f32 %v1096_v1, %v1059_v35  ;;  %v1132_v54 = vadd.f32 %v1128_v44, %v1059_v35  ;;  %v1164_v56 = vadd.f32 %v1160_v45, %v1059_v35 }
 0x28d   :  { %v1072_v5 = vmax.f32 %v1068_v0, 0.0  ;;  %v1104_v3 = vmax.f32 %v1100_v47, 0.0  ;;  %v1136_v6 = vmax.f32 %v1132_v54, 0.0  ;;  %v1168_v60 = vmax.f32 %v1164_v56, 0.0 }
 0x28e   :  { %v1030_v36 = vpop.permute.xlu1 %1029 }
 0x28f   :  { %v1043_v33 = vmul.f32 %v1030_v36, %v1975_v2  ;;  %v1095_v57 = vmul.f32 %v1030_v36, %v2012_v20  ;;  %v1127_v59 = vmul.f32 %v1030_v36, %v1965_v21  ;;  %v1159_v51 = vmul.f32 %v1030_v36, %v2031_v18 }
 0x290   :  { %v1045_v21 = vmul.f32 %v1040_v24, %v1952_v32  ;;  %v1097_v18 = vmul.f32 %v1040_v24, %v1998_v55 }
 0x292   :  { %v1049_v40 = vpop.permute.xlu1 %1048 }
 0x293   :  { %v1066_v46 = vadd.f32 %v1049_v40, %v1042_v61  ;;  %v1098_v25 = vadd.f32 %v1094_v23, %v1049_v40  ;;  %v1130_v27 = vadd.f32 %v1126_v28, %v1049_v40  ;;  %v1162_v29 = vadd.f32 %v1158_v4, %v1049_v40 }
 0x295   :  { %v1070_v22 = vmax.f32 %v1066_v46, 0.0  ;;  %v1102_v34 = vmax.f32 %v1098_v25, 0.0  ;;  %v1134_v39 = vmax.f32 %v1130_v27, 0.0  ;;  %v1166_v42 = vmax.f32 %v1162_v29, 0.0 }
 0x296   :  { %v1054_v58 = vpop.permute.xlu1 %1053 }
 0x297   :  { %v1067_v26 = vadd.f32 %v1054_v58, %v1043_v33  ;;  %v1099_v48 = vadd.f32 %v1095_v57, %v1054_v58  ;;  %v1131_v19 = vadd.f32 %v1127_v59, %v1054_v58  ;;  %v1163_v37 = vadd.f32 %v1159_v51, %v1054_v58 }
 0x299   :  { %v1071_v2 = vmax.f32 %v1067_v26, 0.0  ;;  %v1103_v49 = vmax.f32 %v1099_v48, 0.0  ;;  %v1135_v20 = vmax.f32 %v1131_v19, 0.0  ;;  %v1167_v43 = vmax.f32 %v1163_v37, 0.0 }
 0x29a   :  { %v1064_v17 = vpop.permute.xlu1 %1063 }
 0x29b   :  { %v1313_v16 = vpack.c.bf16 %v1071_v2, %v1070_v22  ;;  %v1323_v11 = vpack.c.bf16 %v1103_v49, %v1102_v34  ;;  %v1333_v13 = vpack.c.bf16 %v1135_v20, %v1134_v39  ;;  %v1343_v14 = vpack.c.bf16 %v1167_v43, %v1166_v42 }
 0x29c   :  { %v1069_v52 = vadd.f32 %v1064_v17, %v1045_v21  ;;  %v1101_v30 = vadd.f32 %v1097_v18, %v1064_v17  ;;  %v1133_v31 = vadd.f32 %v1129_v50, %v1064_v17  ;;  %v1165_v53 = vadd.f32 %v1161_v15, %v1064_v17 }
 0x29d   :  { %1314 = vst [vmem:[%s2127_s4] sm:$0xff] %v1313_v16   ;;  %1351 = vst [vmem:[%s2127_s4 + $0x10] sm:$0xff] %v1323_v11  }
 0x29e   :  { %1353 = vst [vmem:[%s2127_s4 + $0x20] sm:$0xff] %v1333_v13   ;;  %1355 = vst [vmem:[%s2127_s4 + $0x30] sm:$0xff] %v1343_v14   ;;  %v1073_v32 = vmax.f32 %v1069_v52, 0.0  ;;  %v1105_v7 = vmax.f32 %v1101_v30, 0.0  ;;  %v1137_v55 = vmax.f32 %v1133_v31, 0.0  ;;  %v1169_v38 = vmax.f32 %v1165_v53, 0.0 }
 0x2a0   :  { %v1318_v8 = vpack.c.bf16 %v1073_v32, %v1072_v5  ;;  %v1328_v9 = vpack.c.bf16 %v1105_v7, %v1104_v3  ;;  %v1338_v63 = vpack.c.bf16 %v1137_v55, %v1136_v6  ;;  %v1348_v12 = vpack.c.bf16 %v1169_v38, %v1168_v60 }
 0x2a2   :  { %1350 = vst [vmem:[%s2127_s4 + $0x8] sm:$0xff] %v1318_v8   ;;  %1352 = vst [vmem:[%s2127_s4 + $0x18] sm:$0xff] %v1328_v9  }
 0x2a3   :  { %1354 = vst [vmem:[%s2127_s4 + $0x28] sm:$0xff] %v1338_v63   ;;  %1356 = vst [vmem:[%s2127_s4 + $0x38] sm:$0xff] %v1348_v12  }

// kernel: generator_forward.6
= control target key start
LH: loop header
LB: loop body
LE: loop exit
PB: predicated region body
PF: predicated region fallthrough
CT: control target
= control target key end

     0   :  { %vm238_vm0 = vcmask 261120   ;;  %s925_s0 = inlined_call_operand.vmem [shape: bf16[288,128], index: 0, kind: input, shape index: {}]   ;;  %s926_s1 = inlined_call_operand.vmem [shape: bf16[64,288], index: 1, kind: input, shape index: {}]   ;;  %s927_s2 = inlined_call_operand.vmem [shape: f32[16,1], index: 2, kind: input, shape index: {}]   ;;  %s928_s3 = inlined_call_operand.vmem [shape: f32[16,1], index: 3, kind: input, shape index: {}]   ;;  %s929_s4 = inlined_call_operand.vmem [shape: bf16[64,128], index: 4, kind: output, shape index: {}]  }
   0x1   :  { %v695_v0 = vld [vmem:[%s925_s0 + $0x78] sm:$0xff]   ;;  %v697_v2 = vld [vmem:[%s925_s0 + $0x70] sm:$0xff]   ;;  %v699_v4 = vld [vmem:[%s925_s0 + $0x68] sm:$0xff]  }
   0x2   :  { %v696_v1 = vld [vmem:[%s925_s0 + $0x38] sm:$0xff]   ;;  %618 = vmatprep.subr.bf16.mxu0 %v695_v0  ;;  %676 = vmatprep.subr.bf16.mxu1 %v695_v0  ;;  %v698_v3 = vld [vmem:[%s925_s0 + $0x30] sm:$0xff]   ;;  %v700_v5 = vld [vmem:[%s925_s0 + $0x28] sm:$0xff]  }
   0x3   :  { %619 = vmatpush3.bf16.msra.mxu0 %v696_v1  ;;  %684 = vmatpush3.bf16.msra.mxu1 %v696_v1  ;;  %v701_v6 = vld [vmem:[%s925_s0 + $0x60] sm:$0xff]   ;;  %v703_v8 = vld [vmem:[%s925_s0 + $0x58] sm:$0xff]   ;;  %v705_v10 = vld [vmem:[%s925_s0 + $0x50] sm:$0xff]  }
   0x4   :  { %620 = vmatprep.subr.bf16.mxu0 %v697_v2  ;;  %677 = vmatprep.subr.bf16.mxu1 %v697_v2  ;;  %v702_v7 = vld [vmem:[%s925_s0 + $0x20] sm:$0xff]   ;;  %v704_v9 = vld [vmem:[%s925_s0 + $0x18] sm:$0xff]   ;;  %v706_v13 = vld [vmem:[%s925_s0 + $0x10] sm:$0xff]  }
   0x5   :  { %v713_v11 = vld [vmem:[%s926_s1 + $0x4] ss:$12 sps:$4 sm:$0xff]   ;;  %v716_v12 = vld [vmem:[%s926_s1 + $0x4c] ss:$12 sps:$4 sm:$0xff]   ;;  %v714_v20 = vld [vmem:[%s926_s1 + $0x48] ss:$12 sps:$4 sm:$0xff]  }
   0x6   :  { %v707_v14 = vld [vmem:[%s925_s0 + $0x48] sm:$0xff]   ;;  %283 = vmatprep.mubr.bf16.mxu0 %v713_v11  ;;  %307 = vmatprep.mubr.bf16.mxu1 %v716_v12  ;;  %v709_v16 = vld [vmem:[%s925_s0 + $0x40] sm:$0xff]   ;;  %v727_v28 = vld [vmem:[%s926_s1 + $0x30] ss:$12 sps:$4 sm:$0xff]  }
   0x7   :  { %621 = vmatpush3.bf16.msra.mxu0 %v698_v3  ;;  %685 = vmatpush3.bf16.msra.mxu1 %v698_v3  ;;  %v708_v15 = vld [vmem:[%s925_s0 + $0x8] sm:$0xff]   ;;  %v710_v17 = vld [vmem:[%s925_s0] sm:$0xff]   ;;  %v728_v29 = vld [vmem:[%s926_s1 + $0x50] ss:$12 sps:$4 sm:$0xff]  }
   0x8   :  { %622 = vmatprep.subr.bf16.mxu0 %v699_v4  ;;  %678 = vmatprep.subr.bf16.mxu1 %v699_v4  ;;  %v717_v18 = vld [vmem:[%s925_s0 + $0x88] sm:$0xff]   ;;  %v718_v22 = vld [vmem:[%s925_s0 + $0x80] sm:$0xff]  }
   0x9   :  { %v711_v19 = vld [vmem:[%s926_s1] ss:$12 sps:$4 sm:$0xff]   ;;  %v719_v21 = vld [vmem:[%s926_s1 + $0x1c] ss:$12 sps:$4 sm:$0xff]   ;;  %v722_v24 = vld [vmem:[%s926_s1 + $0x18] ss:$12 sps:$4 sm:$0xff]  }
   0xa   :  { %v721_v23 = vld [vmem:[%s926_s1 + $0x8] ss:$12 sps:$4 sm:$0xff]   ;;  %v723_v25 = vld [vmem:[%s926_s1 + $0x20] ss:$12 sps:$4 sm:$0xff]   ;;  %v726_v27 = vld [vmem:[%s926_s1 + $0x38] ss:$12 sps:$4 sm:$0xff]  }
   0xb   :  { %623 = vmatpush3.bf16.msra.mxu0 %v700_v5  ;;  %686 = vmatpush3.bf16.msra.mxu1 %v700_v5  ;;  %v724_v26 = vld [vmem:[%s926_s1 + $0x34] ss:$12 sps:$4 sm:$0xff]  }
   0xc   :  { %624 = vmatprep.subr.bf16.mxu0 %v701_v6  ;;  %679 = vmatprep.subr.bf16.mxu1 %v701_v6 }
   0xf   :  { %625 = vmatpush3.bf16.msra.mxu0 %v702_v7  ;;  %687 = vmatpush3.bf16.msra.mxu1 %v702_v7 }
  0x10   :  { %626 = vmatprep.subr.bf16.mxu0 %v703_v8  ;;  %680 = vmatprep.subr.bf16.mxu1 %v703_v8 }
  0x13   :  { %627 = vmatpush3.bf16.msra.mxu0 %v704_v9  ;;  %688 = vmatpush3.bf16.msra.mxu1 %v704_v9 }
  0x14   :  { %628 = vmatprep.subr.bf16.mxu0 %v705_v10  ;;  %681 = vmatprep.subr.bf16.mxu1 %v705_v10 }
  0x17   :  { %629 = vmatpush3.bf16.msra.mxu0 %v706_v13  ;;  %689 = vmatpush3.bf16.msra.mxu1 %v706_v13 }
  0x18   :  { %630 = vmatprep.subr.bf16.mxu0 %v707_v14  ;;  %682 = vmatprep.subr.bf16.mxu1 %v707_v14  ;;  %v733_v14 = vmov 0  }
  0x19   :  { %693 = vset.pattern.permute.xlu0 %v733_v14  ;;  %694 = vset.pattern.permute.xlu1 %v733_v14 }
  0x1b   :  { %631 = vmatpush3.bf16.msra.mxu0 %v708_v15  ;;  %690 = vmatpush3.bf16.msra.mxu1 %v708_v15 }
  0x1c   :  { %632 = vmatprep.subr.bf16.mxu0 %v709_v16  ;;  %683 = vmatprep.subr.bf16.mxu1 %v709_v16 }
  0x1f   :  { %633 = vmatpush3.bf16.msra.mxu0 %v710_v17  ;;  %691 = vmatpush3.bf16.msra.mxu1 %v710_v17 }
  0x20   :  { %664 = vmatprep.subr.bf16.mxu1 %v717_v18 }
  0x22   :  { %284 = vmatmul.mubr.bf16.vlgmr.msra.gmra.mxu0 %v711_v19  ;;  %308 = vmatmul.mubr.bf16.vlgmr.msra.gmra.mxu1 %v714_v20 }
  0x23   :  { %665 = vmatpush3.bf16.msra.mxu1 %v717_v18  ;;  %291 = vmatprep.mubr.bf16.mxu0 %v719_v21 }
  0x24   :  { %666 = vmatprep.subr.bf16.mxu1 %v718_v22  ;;  %668 = vmatprep.mubr.msk.bf16.mxu1 %vm238_vm0, %v721_v23 }
  0x27   :  { %667 = vmatpush3.bf16.msra.mxu1 %v718_v22 }
  0x2a   :  { %292 = vmatmul.mubr.bf16.gmra.mxu0 %v722_v24  ;;  %669 = vmatmul.mubr.msk.bf16.vlgmr.msra.gmra.mxu1 %vm238_vm0, %v723_v25 }
  0x2b   :  { %299 = vmatprep.mubr.bf16.mxu0 %v724_v26  ;;  %672 = vmatprep.mubr.msk.bf16.mxu1 %vm238_vm0, %v726_v27 }
  0x32   :  { %300 = vmatmul.mubr.bf16.gmra.mxu0 %v727_v28  ;;  %673 = vmatmul.mubr.msk.bf16.gmra.mxu1 %vm238_vm0, %v728_v29 }
  0xe2   :  { %v634_v30 = vpop.f32.mrf.mxu0  ;;  %v652_v31 = vpop.f32.mrf.mxu1 }
  0xe4   :  { %v635_v32 = vpop.f32.mrf.mxu0  ;;  %v653_v33 = vpop.f32.mrf.mxu1 }
  0xe5   :  { %v636_v40 = vadd.f32 %v635_v32, %v634_v30  ;;  %v654_v62 = vadd.f32 %v653_v33, %v652_v31 }
  0xe6   :  { %v637_v34 = vpop.f32.mrf.mxu0  ;;  %v655_v35 = vpop.f32.mrf.mxu1 }
  0xe8   :  { %v638_v36 = vpop.f32.mrf.mxu0  ;;  %v656_v37 = vpop.f32.mrf.mxu1 }
  0xe9   :  { %v639_v50 = vadd.f32 %v638_v36, %v637_v34  ;;  %v657_v2 = vadd.f32 %v656_v37, %v655_v35 }
  0xea   :  { %v640_v38 = vpop.f32.mrf.mxu0  ;;  %v670_v39 = vpop.f32.mrf.mxu1 }
  0xec   :  { %v641_v41 = vpop.f32.mrf.mxu0  ;;  %v350_v42 = vpop.f32.mrf.mxu1 }
  0xed   :  { %v642_v43 = vadd.f32 %v641_v41, %v640_v38  ;;  %v853_v44 = vadd.f32 %v636_v40, %v350_v42 }
  0xee   :  { %v643_v45 = vpop.f32.mrf.mxu0  ;;  %v671_v46 = vpop.f32.mrf.mxu1 }
  0xef   :  { %v855_v47 = vadd.f32 %v670_v39, %v642_v43  ;;  %381 = vadd.xlane.f32.xlu0 %v853_v44  ;;  %v397_v52 = vmul.f32 %v853_v44, %v853_v44 }
  0xf0   :  { %v644_v48 = vpop.f32.mrf.mxu0  ;;  %v353_v49 = vpop.f32.mrf.mxu1 }
  0xf1   :  { %v645_v51 = vadd.f32 %v644_v48, %v643_v45  ;;  %385 = vadd.xlane.f32.xlu1 %v855_v47  ;;  %v863_v55 = vadd.f32 %v639_v50, %v353_v49  ;;  %v399_v61 = vmul.f32 %v855_v47, %v855_v47 }
  0xf2   :  { %v646_v53 = vpop.f32.mrf.mxu0  ;;  %v674_v56 = vpop.f32.mrf.mxu1 }
  0xf3   :  { %v861_v54 = vadd.f32 %v671_v46, %v645_v51  ;;  %405 = vadd.xlane.f32.xlu0 %v397_v52  ;;  %v398_v58 = vmul.f32 %v863_v55, %v863_v55  ;;  %v873_v3 = vadd.f32 %v674_v56, %v654_v62 }
  0xf4   :  { %v647_v57 = vpop.f32.mrf.mxu0  ;;  %v366_v59 = vpop.f32.mrf.mxu1 }
  0xf5   :  { %387 = vadd.xlane.f32.xlu1 %v861_v54  ;;  %v400_v63 = vmul.f32 %v861_v54, %v861_v54  ;;  %v648_v4 = vadd.f32 %v647_v57, %v646_v53  ;;  %v403_v12 = vmul.f32 %v873_v3, %v873_v3 }
  0xf6   :  { %v649_v60 = vpop.f32.mrf.mxu0  ;;  %v675_v0 = vpop.f32.mrf.mxu1 }
  0xf7   :  { %383 = vadd.xlane.f32.xlu0 %v863_v55  ;;  %v875_v5 = vadd.f32 %v675_v0, %v657_v2  ;;  %v878_v8 = vadd.f32 %v648_v4, %v366_v59  ;;  %v443_v59 = vld [vmem:[%s927_s2] sm:$0xff] }
  0xf8   :  { %v650_v1 = vpop.f32.mrf.mxu0  ;;  %v369_v7 = vpop.f32.mrf.mxu1  ;;  %v451_v2 = vld [vmem:[%s928_s3] sm:$0xff] }
  0xf9   :  { %407 = vadd.xlane.f32.xlu1 %v398_v58  ;;  %v651_v6 = vadd.f32 %v650_v1, %v649_v60  ;;  %v401_v10 = vmul.f32 %v878_v8, %v878_v8  ;;  %v404_v13 = vmul.f32 %v875_v5, %v875_v5 }
  0xfb   :  { %409 = vadd.xlane.f32.xlu0 %v399_v61  ;;  %v881_v9 = vadd.f32 %v651_v6, %v369_v7  ;;  %v444_v61 = vld [vmem:[%s927_s2 + $0x8] sm:$0xff] }
  0xfc   :  { %v452_v7 = vld [vmem:[%s928_s3 + $0x8] sm:$0xff] }
  0xfd   :  { %411 = vadd.xlane.f32.xlu1 %v400_v63  ;;  %v402_v11 = vmul.f32 %v881_v9, %v881_v9 }
  0xff   :  { %393 = vadd.xlane.f32.xlu0 %v873_v3 }
 0x101   :  { %395 = vadd.xlane.f32.xlu1 %v875_v5 }
 0x103   :  { %389 = vadd.xlane.f32.xlu0 %v878_v8 }
 0x105   :  { %391 = vadd.xlane.f32.xlu1 %v881_v9 }
 0x107   :  { %413 = vadd.xlane.f32.xlu0 %v401_v10 }
 0x109   :  { %415 = vadd.xlane.f32.xlu1 %v402_v11 }
 0x10b   :  { %417 = vadd.xlane.f32.xlu0 %v403_v12 }
 0x10d   :  { %419 = vadd.xlane.f32.xlu1 %v404_v13 }
 0x178   :  { %v382_v15 = vpop.xlane.xlu0 %381 }
 0x17a   :  { %v386_v16 = vpop.xlane.xlu1 %385 }
 0x17b   :  { %v421_v25 = vadd.f32 %v386_v16, %v382_v15 }
 0x17c   :  { %v406_v17 = vpop.xlane.xlu0 %405 }
 0x17e   :  { %v388_v18 = vpop.xlane.xlu1 %387 }
 0x180   :  { %v384_v19 = vpop.xlane.xlu0 %383 }
 0x181   :  { %v422_v27 = vadd.f32 %v388_v18, %v384_v19 }
 0x182   :  { %v408_v20 = vpop.xlane.xlu1 %407 }
 0x184   :  { %v410_v21 = vpop.xlane.xlu0 %409 }
 0x185   :  { %v427_v33 = vadd.f32 %v410_v21, %v406_v17 }
 0x186   :  { %v412_v22 = vpop.xlane.xlu1 %411 }
 0x187   :  { %v428_v36 = vadd.f32 %v412_v22, %v408_v20 }
 0x188   :  { %v394_v23 = vpop.xlane.xlu0 %393 }
 0x18a   :  { %v396_v24 = vpop.xlane.xlu1 %395 }
 0x18c   :  { %v390_v26 = vpop.xlane.xlu0 %389 }
 0x18d   :  { %v423_v28 = vadd.f32 %v421_v25, %v390_v26 }
 0x18e   :  { %v392_v29 = vpop.xlane.xlu1 %391 }
 0x18f   :  { %v425_v30 = vadd.f32 %v423_v28, %v394_v23  ;;  %v424_v31 = vadd.f32 %v422_v27, %v392_v29 }
 0x190   :  { %v414_v32 = vpop.xlane.xlu0 %413 }
 0x191   :  { %v426_v34 = vadd.f32 %v424_v31, %v396_v24  ;;  %v433_v37 = vmul.f32 0.001953125, %v425_v30  ;;  %v429_v38 = vadd.f32 %v427_v33, %v414_v32 }
 0x192   :  { %v416_v35 = vpop.xlane.xlu1 %415 }
 0x193   :  { %v434_v40 = vmul.f32 0.001953125, %v426_v34  ;;  %v430_v41 = vadd.f32 %v428_v36, %v416_v35  ;;  %v437_v45 = vmul.f32 %v433_v37, %v433_v37 }
 0x194   :  { %v418_v39 = vpop.xlane.xlu0 %417 }
 0x195   :  { %v431_v42 = vadd.f32 %v429_v38, %v418_v39  ;;  %v438_v51 = vmul.f32 %v434_v40, %v434_v40 }
 0x196   :  { %v420_v43 = vpop.xlane.xlu1 %419 }
 0x197   :  { %v435_v46 = vmul.f32 0.001953125, %v431_v42  ;;  %v432_v48 = vadd.f32 %v430_v41, %v420_v43 }
 0x199   :  { %v439_v49 = vsub.f32 %v435_v46, %v437_v45  ;;  %v436_v50 = vmul.f32 0.001953125, %v432_v48 }
 0x19b   :  { %v441_v52 = vmax.f32 %v439_v49, 0.0  ;;  %v440_v53 = vsub.f32 %v436_v50, %v438_v51 }
 0x19d   :  { %v445_v56 = vadd.f32 1e-05, %v441_v52  ;;  %v442_v57 = vmax.f32 %v440_v53, 0.0 }
 0x19f   :  { %729 = vrsqrt.f32 %v445_v56  ;;  %v446_v58 = vadd.f32 1e-05, %v442_v57 }
 0x1a1   :  { %731 = vrsqrt.f32 %v446_v58 }
 0x1ac   :  { %v730_v60 = vpop.eup %729 }
 0x1ad   :  { %v449_v62 = vmul.f32 %v730_v60, %v443_v59 }
 0x1ae   :  { %v732_v63 = vpop.eup %731 }
 0x1af   :  { %459 = vperm.xlu0 %693, %v449_v62   ;;  %v450_v0 = vmul.f32 %v732_v63, %v444_v61  ;;  %v453_v1 = vmul.f32 %v449_v62, %v433_v37 }
 0x1b1   :  { %464 = vperm.xlu1 %694, %v450_v0   ;;  %v455_v4 = vsub.f32 %v451_v2, %v453_v1  ;;  %v454_v6 = vmul.f32 %v450_v0, %v434_v40 }
 0x1b3   :  { %v456_v10 = vsub.f32 %v452_v7, %v454_v6 }
 0x1b5   :  { %471 = vperm.xlu1 %694, %v455_v4  }
 0x1b9   :  { %476 = vperm.xlu1 %694, %v456_v10  }
 0x22a   :  { %v460_v12 = vpop.permute.xlu0 %459 }
 0x22b   :  { %v467_v13 = vmul.f32 %v460_v12, %v853_v44  ;;  %v493_v14 = vmul.f32 %v460_v12, %v855_v47  ;;  %v509_v15 = vmul.f32 %v460_v12, %v878_v8  ;;  %v525_v16 = vmul.f32 %v460_v12, %v873_v3 }
 0x22c   :  { %v465_v11 = vpop.permute.xlu1 %464 }
 0x22d   :  { %v468_v22 = vmul.f32 %v465_v11, %v863_v55  ;;  %v494_v23 = vmul.f32 %v465_v11, %v861_v54  ;;  %v510_v24 = vmul.f32 %v465_v11, %v881_v9  ;;  %v526_v25 = vmul.f32 %v465_v11, %v875_v5 }
 0x230   :  { %v472_v17 = vpop.permute.xlu1 %471 }
 0x231   :  { %v479_v18 = vadd.f32 %v472_v17, %v467_v13  ;;  %v495_v19 = vadd.f32 %v493_v14, %v472_v17  ;;  %v511_v20 = vadd.f32 %v509_v15, %v472_v17  ;;  %v527_v21 = vadd.f32 %v525_v16, %v472_v17 }
 0x233   :  { %v481_v28 = vmax.f32 %v479_v18, 0.0  ;;  %v497_v3 = vmax.f32 %v495_v19, 0.0  ;;  %v513_v29 = vmax.f32 %v511_v20, 0.0  ;;  %v529_v30 = vmax.f32 %v527_v21, 0.0 }
 0x234   :  { %v477_v44 = vpop.permute.xlu1 %476 }
 0x235   :  { %v480_v26 = vadd.f32 %v477_v44, %v468_v22  ;;  %v496_v47 = vadd.f32 %v494_v23, %v477_v44  ;;  %v512_v27 = vadd.f32 %v510_v24, %v477_v44  ;;  %v528_v8 = vadd.f32 %v526_v25, %v477_v44 }
 0x237   :  { %v482_v31 = vmax.f32 %v480_v26, 0.0  ;;  %v498_v32 = vmax.f32 %v496_v47, 0.0  ;;  %v514_v33 = vmax.f32 %v512_v27, 0.0  ;;  %v530_v34 = vmax.f32 %v528_v8, 0.0 }
 0x239   :  { %v598_v55 = vpack.c.bf16 %v482_v31, %v481_v28  ;;  %v603_v35 = vpack.c.bf16 %v498_v32, %v497_v3  ;;  %v608_v54 = vpack.c.bf16 %v514_v33, %v513_v29  ;;  %v613_v36 = vpack.c.bf16 %v530_v34, %v529_v30 }
 0x23b   :  { %599 = vst [vmem:[%s929_s4] sm:$0xff] %v598_v55   ;;  %615 = vst [vmem:[%s929_s4 + $0x8] sm:$0xff] %v603_v35  }
 0x23c   :  { %616 = vst [vmem:[%s929_s4 + $0x10] sm:$0xff] %v608_v54   ;;  %617 = vst [vmem:[%s929_s4 + $0x18] sm:$0xff] %v613_v36  }

// kernel: generator_forward.7
= control target key start
LH: loop header
LB: loop body
LE: loop exit
PB: predicated region body
PF: predicated region fallthrough
CT: control target
= control target key end

     0   :  { %vm259_vm0 = vcmask 130048   ;;  %vm477_vm1 = vcmask 1043456   ;;  %vm473_vm2 = vcmask 64512   ;;  %s1513_s0 = inlined_call_operand.vmem [shape: bf16[144,512], index: 0, kind: input, shape index: {}]   ;;  %s1514_s1 = inlined_call_operand.vmem [shape: bf16[32,144], index: 1, kind: input, shape index: {}]   ;;  %s1515_s2 = inlined_call_operand.vmem [shape: f32[8,1], index: 2, kind: input, shape index: {}]   ;;  %s1516_s3 = inlined_call_operand.vmem [shape: f32[8,1], index: 3, kind: input, shape index: {}]   ;;  %s1517_s4 = inlined_call_operand.vmem [shape: bf16[3,8], index: 4, kind: input, shape index: {}]   ;;  %s1518_s5 = inlined_call_operand.vmem [shape: f32[12,512], index: 5, kind: output, shape index: {}]  }
   0x1   :  { %v1041_v0 = vld [vmem:[%s1513_s0 + $0xe4] ss:$16 sps:$4 sm:$0xff]   ;;  %v1043_v1 = vld [vmem:[%s1513_s0 + $0xec] ss:$16 sps:$4 sm:$0xff]   ;;  %v1045_v2 = vld [vmem:[%s1513_s0 + $0xe0] ss:$16 sps:$4 sm:$0xff]  }
   0x2   :  { %266 = vmatprep.subr.bf16.mxu0 %v1041_v0  ;;  %v1046_v3 = vld [vmem:[%s1513_s0 + $0xe8] ss:$16 sps:$4 sm:$0xff]   ;;  %319 = vmatprep.subr.bf16.mxu1 %v1043_v1  ;;  %v1047_v4 = vld [vmem:[%s1513_s0 + $0xc4] ss:$16 sps:$4 sm:$0xff]   ;;  %v1049_v5 = vld [vmem:[%s1513_s0 + $0xcc] ss:$16 sps:$4 sm:$0xff]  }
   0x3   :  { %267 = vmatpush1.bf16.msra.mxu0 %v1045_v2  ;;  %320 = vmatpush1.bf16.msra.mxu1 %v1046_v3  ;;  %v1051_v6 = vld [vmem:[%s1513_s0 + $0xc0] ss:$16 sps:$4 sm:$0xff]   ;;  %v1052_v7 = vld [vmem:[%s1513_s0 + $0xc8] ss:$16 sps:$4 sm:$0xff]   ;;  %v1053_v8 = vld [vmem:[%s1513_s0 + $0xa4] ss:$16 sps:$4 sm:$0xff]  }
   0x4   :  { %268 = vmatprep.subr.bf16.mxu0 %v1047_v4  ;;  %321 = vmatprep.subr.bf16.mxu1 %v1049_v5  ;;  %v1055_v9 = vld [vmem:[%s1513_s0 + $0xac] ss:$16 sps:$4 sm:$0xff]   ;;  %v1057_v10 = vld [vmem:[%s1513_s0 + $0xa0] ss:$16 sps:$4 sm:$0xff]   ;;  %v1058_v11 = vld [vmem:[%s1513_s0 + $0xa8] ss:$16 sps:$4 sm:$0xff]  }
   0x5   :  { %v1059_v12 = vld [vmem:[%s1513_s0 + $0x84] ss:$16 sps:$4 sm:$0xff]   ;;  %v1061_v13 = vld [vmem:[%s1513_s0 + $0x8c] ss:$16 sps:$4 sm:$0xff]   ;;  %v1063_v14 = vld [vmem:[%s1513_s0 + $0x80] ss:$16 sps:$4 sm:$0xff]  }
   0x6   :  { %v1064_v15 = vld [vmem:[%s1513_s0 + $0x88] ss:$16 sps:$4 sm:$0xff]   ;;  %v1065_v16 = vld [vmem:[%s1513_s0 + $0x64] ss:$16 sps:$4 sm:$0xff]   ;;  %v1067_v17 = vld [vmem:[%s1513_s0 + $0x6c] ss:$16 sps:$4 sm:$0xff]  }
   0x7   :  { %269 = vmatpush1.bf16.msra.mxu0 %v1051_v6  ;;  %322 = vmatpush1.bf16.msra.mxu1 %v1052_v7  ;;  %v1069_v18 = vld [vmem:[%s1513_s0 + $0x60] ss:$16 sps:$4 sm:$0xff]   ;;  %v1070_v19 = vld [vmem:[%s1513_s0 + $0x68] ss:$16 sps:$4 sm:$0xff]   ;;  %v1071_v20 = vld [vmem:[%s1513_s0 + $0x44] ss:$16 sps:$4 sm:$0xff]  }
   0x8   :  { %270 = vmatprep.subr.bf16.mxu0 %v1053_v8  ;;  %323 = vmatprep.subr.bf16.mxu1 %v1055_v9  ;;  %v1073_v21 = vld [vmem:[%s1513_s0 + $0x4c] ss:$16 sps:$4 sm:$0xff]   ;;  %v1075_v22 = vld [vmem:[%s1513_s0 + $0x40] ss:$16 sps:$4 sm:$0xff]   ;;  %v1076_v23 = vld [vmem:[%s1513_s0 + $0x48] ss:$16 sps:$4 sm:$0xff]  }
   0x9   :  { %v1077_v24 = vld [vmem:[%s1513_s0 + $0x24] ss:$16 sps:$4 sm:$0xff]   ;;  %v1079_v25 = vld [vmem:[%s1513_s0 + $0x2c] ss:$16 sps:$4 sm:$0xff]   ;;  %v1081_v26 = vld [vmem:[%s1513_s0 + $0x20] ss:$16 sps:$4 sm:$0xff]  }
   0xa   :  { %v1082_v27 = vld [vmem:[%s1513_s0 + $0x28] ss:$16 sps:$4 sm:$0xff]   ;;  %v1083_v28 = vld [vmem:[%s1513_s0 + $0x4] ss:$16 sps:$4 sm:$0xff]   ;;  %v1085_v29 = vld [vmem:[%s1513_s0 + $0xc] ss:$16 sps:$4 sm:$0xff]  }
   0xb   :  { %271 = vmatpush1.bf16.msra.mxu0 %v1057_v10  ;;  %324 = vmatpush1.bf16.msra.mxu1 %v1058_v11  ;;  %v1097_v30 = vld [vmem:[%s1514_s1 + $0x4] ss:$8 sps:$4 sm:$0xff]   ;;  %v1087_v31 = vld [vmem:[%s1513_s0] ss:$16 sps:$4 sm:$0xff]   ;;  %v1088_v32 = vld [vmem:[%s1513_s0 + $0x8] ss:$16 sps:$4 sm:$0xff]  }
   0xc   :  { %272 = vmatprep.subr.bf16.mxu0 %v1059_v12  ;;  %325 = vmatprep.subr.bf16.mxu1 %v1061_v13  ;;  %v1089_v33 = vld [vmem:[%s1513_s0 + $0x104] ss:$16 sps:$4 sm:$0xff]   ;;  %v1091_v34 = vld [vmem:[%s1513_s0 + $0x10c] ss:$16 sps:$4 sm:$0xff]   ;;  %v1093_v35 = vld [vmem:[%s1513_s0 + $0x100] ss:$16 sps:$4 sm:$0xff]  }
   0xd   :  { %1018 = vmatprep.mubr.msk.bf16.mxu0 %vm259_vm0, %v1097_v30  ;;  %1020 = vmatprep.mubr.msk.bf16.mxu1 %vm259_vm0, %v1097_v30  ;;  %v1094_v36 = vld [vmem:[%s1513_s0 + $0x108] ss:$16 sps:$4 sm:$0xff]   ;;  %v1098_v38 = vld [vmem:[%s1514_s1 + $0x14] ss:$8 sps:$4 sm:$0xff]  }
   0xe   :  { %v1095_v37 = vld [vmem:[%s1514_s1] ss:$8 sps:$4 sm:$0xff]   ;;  %v1100_v39 = vld [vmem:[%s1514_s1 + $0x10] ss:$8 sps:$4 sm:$0xff]  }
   0xf   :  { %273 = vmatpush1.bf16.msra.mxu0 %v1063_v14  ;;  %326 = vmatpush1.bf16.msra.mxu1 %v1064_v15 }
  0x10   :  { %274 = vmatprep.subr.bf16.mxu0 %v1065_v16  ;;  %327 = vmatprep.subr.bf16.mxu1 %v1067_v17 }
  0x13   :  { %275 = vmatpush1.bf16.msra.mxu0 %v1069_v18  ;;  %328 = vmatpush1.bf16.msra.mxu1 %v1070_v19 }
  0x14   :  { %276 = vmatprep.subr.bf16.mxu0 %v1071_v20  ;;  %329 = vmatprep.subr.bf16.mxu1 %v1073_v21 }
  0x17   :  { %277 = vmatpush1.bf16.msra.mxu0 %v1075_v22  ;;  %330 = vmatpush1.bf16.msra.mxu1 %v1076_v23 }
  0x18   :  { %278 = vmatprep.subr.bf16.mxu0 %v1077_v24  ;;  %331 = vmatprep.subr.bf16.mxu1 %v1079_v25 }
  0x1b   :  { %279 = vmatpush1.bf16.msra.mxu0 %v1081_v26  ;;  %332 = vmatpush1.bf16.msra.mxu1 %v1082_v27 }
  0x1c   :  { %280 = vmatprep.subr.bf16.mxu0 %v1083_v28  ;;  %333 = vmatprep.subr.bf16.mxu1 %v1085_v29 }
  0x1f   :  { %281 = vmatpush1.bf16.msra.mxu0 %v1087_v31  ;;  %334 = vmatpush1.bf16.msra.mxu1 %v1088_v32  ;;  %v1135_v32 = vmov 0  }
  0x20   :  { %296 = vmatprep.subr.bf16.mxu0 %v1089_v33  ;;  %349 = vmatprep.subr.bf16.mxu1 %v1091_v34 }
  0x21   :  { %1039 = vset.pattern.permute.xlu0 %v1135_v32  ;;  %1040 = vset.pattern.permute.xlu1 %v1135_v32 }
  0x23   :  { %297 = vmatpush2.bf16.msra.mxu0 %v1093_v35  ;;  %350 = vmatpush2.bf16.msra.mxu1 %v1094_v36 }
  0x26   :  { %299 = vmatmul.mubr.bf16.vlgmr.msra.gmra.mxu0 %v1095_v37  ;;  %352 = vmatmul.mubr.bf16.vlgmr.msra.gmra.mxu1 %v1095_v37 }
  0x27   :  { %1019 = vmatprep.mubr.msk.bf16.mxu0 %vm259_vm0, %v1098_v38  ;;  %1021 = vmatprep.mubr.msk.bf16.mxu1 %vm259_vm0, %v1098_v38 }
  0x2e   :  { %309 = vmatmul.mubr.bf16.gmra.mxu0 %v1100_v39  ;;  %362 = vmatmul.mubr.bf16.gmra.mxu1 %v1100_v39 }
  0x2f   :  { %522 = vmatprep.mubr.bf16.mxu0 %v1135_v32  ;;  %563 = vmatprep.mubr.bf16.mxu1 %v1135_v32 }
  0xe6   :  { %v1290_v40 = vpop.f32.mrf.mxu0  ;;  %v1292_v41 = vpop.f32.mrf.mxu1 }
  0xe7   :  { %v392_v44 = vmul.f32 %v1290_v40, %v1290_v40  ;;  %v394_v45 = vmul.f32 %v1292_v41, %v1292_v41 }
  0xe8   :  { %v1294_v42 = vpop.f32.mrf.mxu0  ;;  %v1296_v43 = vpop.f32.mrf.mxu1 }
  0xe9   :  { %v372_v46 = vadd.f32 %v1294_v42, %v1290_v40  ;;  %v393_v47 = vmul.f32 %v1294_v42, %v1294_v42  ;;  %v395_v54 = vmul.f32 %v1296_v43, %v1296_v43 }
  0xea   :  { %v1306_v48 = vpop.f32.mrf.mxu0  ;;  %v1308_v49 = vpop.f32.mrf.mxu1 }
  0xeb   :  { %v373_v50 = vadd.f32 %v372_v46, %v1292_v41  ;;  %v408_v51 = vadd.f32 %v393_v47, %v392_v44  ;;  %v396_v59 = vmul.f32 %v1306_v48, %v1306_v48  ;;  %v398_v0 = vmul.f32 %v1308_v49, %v1308_v49 }
  0xec   :  { %v1311_v52 = vpop.f32.mrf.mxu0  ;;  %v1313_v53 = vpop.f32.mrf.mxu1 }
  0xed   :  { %v377_v55 = vadd.f32 %v1311_v52, %v1306_v48  ;;  %v397_v56 = vmul.f32 %v1311_v52, %v1311_v52  ;;  %v374_v57 = vadd.f32 %v373_v50, %v1296_v43  ;;  %v409_v58 = vadd.f32 %v408_v51, %v394_v45 }
  0xee   :  { %v1324_v60 = vpop.f32.mrf.mxu0  ;;  %v1326_v61 = vpop.f32.mrf.mxu1  ;;  %v399_v10 = vmul.f32 %v1313_v53, %v1313_v53 }
  0xef   :  { %375 = vadd.xlane.f32.xlu0 %v374_v57  ;;  %v410_v62 = vadd.f32 %v409_v58, %v395_v54  ;;  %v378_v63 = vadd.f32 %v377_v55, %v1308_v49  ;;  %v400_v1 = vmul.f32 %v1324_v60, %v1324_v60  ;;  %v413_v4 = vadd.f32 %v397_v56, %v396_v59 }
  0xf0   :  { %v1333_v2 = vpop.f32.mrf.mxu0  ;;  %v1335_v3 = vpop.f32.mrf.mxu1  ;;  %v402_v5 = vmul.f32 %v1326_v61, %v1326_v61 }
  0xf1   :  { %v382_v6 = vadd.f32 %v1333_v2, %v1324_v60  ;;  %v401_v7 = vmul.f32 %v1333_v2, %v1333_v2  ;;  %411 = vadd.xlane.f32.xlu1 %v410_v62  ;;  %v379_v8 = vadd.f32 %v378_v63, %v1313_v53  ;;  %v414_v11 = vadd.f32 %v413_v4, %v398_v0  ;;  %v439_v63 = vld [vmem:[%s1515_s2] sm:$0xff] }
  0xf2   :  { %v1344_v9 = vpop.f32.mrf.mxu0  ;;  %v1351_v15 = vpop.f32.mrf.mxu1  ;;  %v403_v22 = vmul.f32 %v1335_v3, %v1335_v3  ;;  %v443_v4 = vld [vmem:[%s1516_s3] sm:$0xff] }
  0xf3   :  { %380 = vadd.xlane.f32.xlu0 %v379_v8  ;;  %v383_v12 = vadd.f32 %v382_v6, %v1326_v61  ;;  %v418_v13 = vadd.f32 %v401_v7, %v400_v1  ;;  %v404_v14 = vmul.f32 %v1344_v9, %v1344_v9  ;;  %v415_v17 = vadd.f32 %v414_v11, %v399_v10 }
  0xf4   :  { %v1353_v16 = vpop.f32.mrf.mxu0  ;;  %v406_v23 = vmul.f32 %v1351_v15, %v1351_v15  ;;  %v1365_v26 = vpop.f32.mrf.mxu1 }
  0xf5   :  { %v387_v18 = vadd.f32 %v1353_v16, %v1344_v9  ;;  %v405_v19 = vmul.f32 %v1353_v16, %v1353_v16  ;;  %v384_v20 = vadd.f32 %v383_v12, %v1335_v3  ;;  %v419_v21 = vadd.f32 %v418_v13, %v402_v5 }
  0xf6   :  { %v407_v30 = vmul.f32 %v1365_v26, %v1365_v26 }
  0xf7   :  { %416 = vadd.xlane.f32.xlu0 %v415_v17  ;;  %385 = vadd.xlane.f32.xlu1 %v384_v20  ;;  %v388_v24 = vadd.f32 %v387_v18, %v1351_v15  ;;  %v423_v25 = vadd.f32 %v405_v19, %v404_v14  ;;  %v420_v27 = vadd.f32 %v419_v21, %v403_v22 }
  0xf9   :  { %v389_v28 = vadd.f32 %v388_v24, %v1365_v26  ;;  %v424_v29 = vadd.f32 %v423_v25, %v406_v23 }
  0xfb   :  { %421 = vadd.xlane.f32.xlu0 %v420_v27  ;;  %390 = vadd.xlane.f32.xlu1 %v389_v28  ;;  %v425_v31 = vadd.f32 %v424_v29, %v407_v30 }
  0xff   :  { %426 = vadd.xlane.f32.xlu1 %v425_v31 }
 0x178   :  { %v376_v33 = vpop.xlane.xlu0 %375 }
 0x17a   :  { %v412_v34 = vpop.xlane.xlu1 %411 }
 0x17c   :  { %v381_v35 = vpop.xlane.xlu0 %380 }
 0x17d   :  { %v428_v38 = vadd.f32 %v381_v35, %v376_v33 }
 0x180   :  { %v417_v36 = vpop.xlane.xlu0 %416  ;;  %v386_v37 = vpop.xlane.xlu1 %385 }
 0x181   :  { %v429_v39 = vadd.f32 %v428_v38, %v386_v37  ;;  %v431_v46 = vadd.f32 %v417_v36, %v412_v34 }
 0x184   :  { %v422_v44 = vpop.xlane.xlu0 %421  ;;  %v391_v45 = vpop.xlane.xlu1 %390 }
 0x185   :  { %v430_v47 = vadd.f32 %v429_v39, %v391_v45  ;;  %v432_v50 = vadd.f32 %v431_v46, %v422_v44  ;;  %v446_v46 = vld [vmem:[%s1517_s4] sm:$0x3] }
 0x187   :  { %v434_v51 = vmul.f32 0.00048828125, %v430_v47 }
 0x188   :  { %v427_v54 = vpop.xlane.xlu1 %426 }
 0x189   :  { %v433_v55 = vadd.f32 %v432_v50, %v427_v54  ;;  %v436_v56 = vmul.f32 %v434_v51, %v434_v51 }
 0x18b   :  { %v435_v57 = vmul.f32 0.00048828125, %v433_v55 }
 0x18d   :  { %v437_v58 = vsub.f32 %v435_v57, %v436_v56 }
 0x18f   :  { %v438_v59 = vmax.f32 %v437_v58, 0.0 }
 0x191   :  { %v440_v62 = vadd.f32 1e-05, %v438_v59 }
 0x193   :  { %1101 = vrsqrt.f32 %v440_v62 }
 0x1a0   :  { %v1102_v0 = vpop.eup %1101 }
 0x1a1   :  { %v442_v1 = vmul.f32 %v1102_v0, %v439_v63 }
 0x1a3   :  { %449 = vperm.xlu0 %1039, %v442_v1   ;;  %v444_v5 = vmul.f32 %v442_v1, %v434_v51 }
 0x1a5   :  { %v445_v6 = vsub.f32 %v443_v4, %v444_v5 }
 0x1a7   :  { %458 = vperm.xlu1 %1040, %v445_v6  }
 0x21e   :  { %v1380_v7 = vpop.permute.xlu0 %449 }
 0x21f   :  { %v453_v8 = vmul.f32 %v1380_v7, %v1294_v42  ;;  %v455_v10 = vmul.f32 %v1380_v7, %v1296_v43  ;;  %v452_v11 = vmul.f32 %v1380_v7, %v1290_v40  ;;  %v454_v12 = vmul.f32 %v1380_v7, %v1292_v41 }
 0x220   :  { %v581_v13 = vmul.f32 %v1380_v7, %v1311_v52  ;;  %v583_v14 = vmul.f32 %v1380_v7, %v1313_v53  ;;  %v580_v17 = vmul.f32 %v1380_v7, %v1306_v48  ;;  %v582_v42 = vmul.f32 %v1380_v7, %v1308_v49 }
 0x221   :  { %v711_v43 = vmul.f32 %v1380_v7, %v1333_v2  ;;  %v713_v40 = vmul.f32 %v1380_v7, %v1335_v3  ;;  %v710_v41 = vmul.f32 %v1380_v7, %v1324_v60  ;;  %v712_v52 = vmul.f32 %v1380_v7, %v1326_v61 }
 0x222   :  { %v1400_v18 = vpop.permute.xlu1 %458  ;;  %v845_v48 = vmul.f32 %v1380_v7, %v1353_v16  ;;  %v847_v51 = vmul.f32 %v1380_v7, %v1365_v26  ;;  %v844_v1 = vmul.f32 %v1380_v7, %v1344_v9  ;;  %v846_v4 = vmul.f32 %v1380_v7, %v1351_v15 }
 0x223   :  { %v462_v53 = vadd.f32 %v1400_v18, %v453_v8  ;;  %v464_v49 = vadd.f32 %v1400_v18, %v455_v10  ;;  %v461_v2 = vadd.f32 %v1400_v18, %v452_v11  ;;  %v463_v19 = vadd.f32 %v1400_v18, %v454_v12 }
 0x224   :  { %v585_v20 = vadd.f32 %v581_v13, %v1400_v18  ;;  %v587_v3 = vadd.f32 %v583_v14, %v1400_v18  ;;  %v584_v60 = vadd.f32 %v580_v17, %v1400_v18  ;;  %v586_v21 = vadd.f32 %v582_v42, %v1400_v18 }
 0x225   :  { %v466_v61 = vmax.f32 %v462_v53, 0.0  ;;  %v468_v22 = vmax.f32 %v464_v49, 0.0  ;;  %v465_v23 = vmax.f32 %v461_v2, 0.0  ;;  %v467_v16 = vmax.f32 %v463_v19, 0.0 }
 0x226   :  { %v589_v24 = vmax.f32 %v585_v20, 0.0  ;;  %v591_v25 = vmax.f32 %v587_v3, 0.0  ;;  %v588_v27 = vmax.f32 %v584_v60, 0.0  ;;  %v590_v28 = vmax.f32 %v586_v21, 0.0 }
 0x227   :  { %v470_v29 = vpack.c.bf16 %v466_v61, %v466_v61  ;;  %v472_v30 = vpack.c.bf16 %v468_v22, %v468_v22  ;;  %v469_v31 = vpack.c.bf16 %v465_v23, %v465_v23  ;;  %v471_v33 = vpack.c.bf16 %v467_v16, %v467_v16 }
 0x228   :  { %v593_v34 = vpack.c.bf16 %v589_v24, %v589_v24  ;;  %v595_v35 = vpack.c.bf16 %v591_v25, %v591_v25  ;;  %v592_v36 = vpack.c.bf16 %v588_v27, %v588_v27  ;;  %v594_v37 = vpack.c.bf16 %v590_v28, %v590_v28 }
 0x229   :  { %1022 = vmatprep.subr.msk.bf16.mxu0 %vm477_vm1, %v470_v29  ;;  %1024 = vmatprep.subr.msk.bf16.mxu1 %vm477_vm1, %v472_v30  ;;  %v479_v38 = vsel %vm477_vm1, %v469_v31, 0  ;;  %v485_v39 = vsel %vm477_vm1, %v471_v33, 0  ;;  %v715_v44 = vadd.f32 %v711_v43, %v1400_v18  ;;  %v717_v45 = vadd.f32 %v713_v40, %v1400_v18 }
 0x22a   :  { %505 = vmatpush1.bf16.msra.mxu0 %v479_v38  ;;  %546 = vmatpush1.bf16.msra.mxu1 %v485_v39  ;;  %v714_v47 = vadd.f32 %v710_v41, %v1400_v18  ;;  %v716_v50 = vadd.f32 %v712_v52, %v1400_v18  ;;  %v597_v56 = vsel %vm477_vm1, %v592_v36, 0  ;;  %v603_v57 = vsel %vm477_vm1, %v594_v37, 0 }
 0x22b   :  { %1026 = vmatprep.subr.msk.bf16.mxu0 %vm477_vm1, %v593_v34  ;;  %1028 = vmatprep.subr.msk.bf16.mxu1 %vm477_vm1, %v595_v35  ;;  %v719_v54 = vmax.f32 %v715_v44, 0.0  ;;  %v721_v55 = vmax.f32 %v717_v45, 0.0  ;;  %v849_v58 = vadd.f32 %v845_v48, %v1400_v18  ;;  %v851_v59 = vadd.f32 %v847_v51, %v1400_v18 }
 0x22c   :  { %v718_v63 = vmax.f32 %v714_v47, 0.0  ;;  %v720_v0 = vmax.f32 %v716_v50, 0.0  ;;  %v848_v5 = vadd.f32 %v844_v1, %v1400_v18  ;;  %v850_v6 = vadd.f32 %v846_v4, %v1400_v18 }
 0x22d   :  { %1023 = vmatmul.mubr.msk.bf16.vlgmr.msra.gmra.mxu0 %vm473_vm2, %v446_v46  ;;  %1025 = vmatmul.mubr.msk.bf16.vlgmr.msra.gmra.mxu1 %vm473_vm2, %v446_v46  ;;  %v723_v62 = vpack.c.bf16 %v719_v54, %v719_v54  ;;  %v725_v26 = vpack.c.bf16 %v721_v55, %v721_v55  ;;  %v853_v11 = vmax.f32 %v849_v58, 0.0  ;;  %v855_v12 = vmax.f32 %v851_v59, 0.0 }
 0x22e   :  { %623 = vmatpush1.bf16.msra.mxu0 %v597_v56  ;;  %664 = vmatpush1.bf16.msra.mxu1 %v603_v57  ;;  %v722_v8 = vpack.c.bf16 %v718_v63, %v718_v63  ;;  %v724_v10 = vpack.c.bf16 %v720_v0, %v720_v0  ;;  %v852_v9 = vmax.f32 %v848_v5, 0.0  ;;  %v854_v13 = vmax.f32 %v850_v6, 0.0 }
 0x22f   :  { %1030 = vmatprep.subr.msk.bf16.mxu0 %vm477_vm1, %v723_v62  ;;  %1032 = vmatprep.subr.msk.bf16.mxu1 %vm477_vm1, %v725_v26  ;;  %v857_v14 = vpack.c.bf16 %v853_v11, %v853_v11  ;;  %v859_v17 = vpack.c.bf16 %v855_v12, %v855_v12 }
 0x230   :  { %640 = vmatprep.mubr.bf16.mxu0 %v1135_v32  ;;  %681 = vmatprep.mubr.bf16.mxu1 %v1135_v32  ;;  %v727_v15 = vsel %vm477_vm1, %v722_v8, 0  ;;  %v733_v7 = vsel %vm477_vm1, %v724_v10, 0  ;;  %v856_v42 = vpack.c.bf16 %v852_v9, %v852_v9  ;;  %v858_v43 = vpack.c.bf16 %v854_v13, %v854_v13 }
 0x232   :  { %v861_v18 = vsel %vm477_vm1, %v856_v42, 0  ;;  %v867_v40 = vsel %vm477_vm1, %v858_v43, 0 }
 0x235   :  { %1027 = vmatmul.mubr.msk.bf16.vlgmr.msra.gmra.mxu0 %vm473_vm2, %v446_v46  ;;  %1029 = vmatmul.mubr.msk.bf16.vlgmr.msra.gmra.mxu1 %vm473_vm2, %v446_v46 }
 0x236   :  { %753 = vmatpush1.bf16.msra.mxu0 %v727_v15  ;;  %794 = vmatpush1.bf16.msra.mxu1 %v733_v7 }
 0x237   :  { %1034 = vmatprep.subr.msk.bf16.mxu0 %vm477_vm1, %v857_v14  ;;  %1036 = vmatprep.subr.msk.bf16.mxu1 %vm477_vm1, %v859_v17 }
 0x238   :  { %770 = vmatprep.mubr.bf16.mxu0 %v1135_v32  ;;  %811 = vmatprep.mubr.bf16.mxu1 %v1135_v32 }
 0x23d   :  { %1031 = vmatmul.mubr.msk.bf16.vlgmr.msra.gmra.mxu0 %vm473_vm2, %v446_v46  ;;  %1033 = vmatmul.mubr.msk.bf16.vlgmr.msra.gmra.mxu1 %vm473_vm2, %v446_v46 }
 0x23e   :  { %887 = vmatpush1.bf16.msra.mxu0 %v861_v18  ;;  %928 = vmatpush1.bf16.msra.mxu1 %v867_v40 }
 0x23f   :  { %904 = vmatprep.mubr.bf16.mxu0 %v1135_v32  ;;  %945 = vmatprep.mubr.bf16.mxu1 %v1135_v32 }
 0x245   :  { %1035 = vmatmul.mubr.msk.bf16.vlgmr.msra.gmra.mxu0 %vm473_vm2, %v446_v46  ;;  %1037 = vmatmul.mubr.msk.bf16.vlgmr.msra.gmra.mxu1 %vm473_vm2, %v446_v46 }
 0x2ed   :  { %v524_v41 = vpop.f32.mrf.mxu0  ;;  %v565_v52 = vpop.f32.mrf.mxu1 }
 0x2ee   :  { %1103 = vtanh.f32 %v524_v41 }
 0x2ef   :  { %1105 = vtanh.f32 %v565_v52  ;;  %v526_v48 = vpop.f32.mrf.mxu0  ;;  %v567_v53 = vpop.f32.mrf.mxu1 }
 0x2f0   :  { %1107 = vtanh.f32 %v526_v48 }
 0x2f1   :  { %1109 = vtanh.f32 %v567_v53  ;;  %v528_v49 = vpop.f32.mrf.mxu0  ;;  %v569_v2 = vpop.f32.mrf.mxu1 }
 0x2f3   :  { %v529_v19 = vpop.f32.mrf.mxu0  ;;  %v570_v20 = vpop.f32.mrf.mxu1 }
 0x2f5   :  { %v642_v3 = vpop.f32.mrf.mxu0  ;;  %v683_v60 = vpop.f32.mrf.mxu1 }
 0x2f6   :  { %1111 = vtanh.f32 %v642_v3 }
 0x2f7   :  { %1113 = vtanh.f32 %v683_v60  ;;  %v644_v32 = vpop.f32.mrf.mxu0  ;;  %v685_v21 = vpop.f32.mrf.mxu1 }
 0x2f8   :  { %1115 = vtanh.f32 %v644_v32 }
 0x2f9   :  { %1117 = vtanh.f32 %v685_v21  ;;  %v646_v61 = vpop.f32.mrf.mxu0  ;;  %v687_v22 = vpop.f32.mrf.mxu1 }
 0x2fb   :  { %v1104_v23 = vpop.eup %1103  ;;  %v647_v16 = vpop.f32.mrf.mxu0 }
 0x2fc   :  { %v688_v24 = vpop.f32.mrf.mxu1  ;;  %v1106_v25 = vpop.eup %1105  ;;  %576 = vst [vmem:[%s1518_s5] sm:$0x7] %v1104_v23 }
 0x2fd   :  { %v1108_v27 = vpop.eup %1107  ;;  %578 = vst [vmem:[%s1518_s5 + $0x10] sm:$0x7] %v1106_v25  ;;  %v772_v28 = vpop.f32.mrf.mxu0 }
 0x2fe   :  { %v813_v29 = vpop.f32.mrf.mxu1  ;;  %v1110_v30 = vpop.eup %1109  ;;  %577 = vst [vmem:[%s1518_s5 + $0x8] sm:$0x7] %v1108_v27  ;;  %1119 = vtanh.f32 %v772_v28 }
 0x2ff   :  { %579 = vst [vmem:[%s1518_s5 + $0x18] sm:$0x7] %v1110_v30  ;;  %1121 = vtanh.f32 %v813_v29  ;;  %v774_v31 = vpop.f32.mrf.mxu0 }
 0x300   :  { %v815_v33 = vpop.f32.mrf.mxu1  ;;  %1123 = vtanh.f32 %v774_v31 }
 0x301   :  { %1125 = vtanh.f32 %v815_v33  ;;  %v776_v34 = vpop.f32.mrf.mxu0 }
 0x302   :  { %v817_v35 = vpop.f32.mrf.mxu1 }
 0x303   :  { %v1112_v36 = vpop.eup %1111  ;;  %v777_v37 = vpop.f32.mrf.mxu0 }
 0x304   :  { %v818_v38 = vpop.f32.mrf.mxu1  ;;  %v1114_v39 = vpop.eup %1113  ;;  %v698_v44 = vrot.slane %v1112_v36, 5 }
 0x305   :  { %v1116_v45 = vpop.eup %1115  ;;  %v700_v46 = vrot.slane %v1114_v39, 5  ;;  %v906_v47 = vpop.f32.mrf.mxu0 }
 0x306   :  { %v947_v50 = vpop.f32.mrf.mxu1  ;;  %v1118_v51 = vpop.eup %1117  ;;  %706 = vst [vmem:[%s1518_s5] sm:$0x38] %v698_v44  ;;  %v699_v54 = vrot.slane %v1116_v45, 5  ;;  %1127 = vtanh.f32 %v906_v47 }
 0x307   :  { %708 = vst [vmem:[%s1518_s5 + $0x10] sm:$0x38] %v700_v46  ;;  %v701_v55 = vrot.slane %v1118_v51, 5  ;;  %1129 = vtanh.f32 %v947_v50  ;;  %v908_v56 = vpop.f32.mrf.mxu0 }
 0x308   :  { %v949_v57 = vpop.f32.mrf.mxu1  ;;  %707 = vst [vmem:[%s1518_s5 + $0x8] sm:$0x38] %v699_v54  ;;  %1131 = vtanh.f32 %v908_v56 }
 0x309   :  { %709 = vst [vmem:[%s1518_s5 + $0x18] sm:$0x38] %v701_v55  ;;  %1133 = vtanh.f32 %v949_v57  ;;  %v910_v58 = vpop.f32.mrf.mxu0 }
 0x30a   :  { %v951_v59 = vpop.f32.mrf.mxu1 }
 0x30b   :  { %v1120_v62 = vpop.eup %1119  ;;  %v911_v26 = vpop.f32.mrf.mxu0 }
 0x30c   :  { %v952_v63 = vpop.f32.mrf.mxu1  ;;  %v1122_v0 = vpop.eup %1121  ;;  %v828_v1 = vrot.slane %v1120_v62, 2 }
 0x30d   :  { %v1124_v4 = vpop.eup %1123  ;;  %v830_v5 = vrot.slane %v1122_v0, 2 }
 0x30e   :  { %v1126_v6 = vpop.eup %1125  ;;  %836 = vst [vmem:[%s1518_s5 + $0x20] ss:$-28 sps:$4 sm:$0xc1] %v828_v1   ;;  %v829_v8 = vrot.slane %v1124_v4, 2 }
 0x30f   :  { %838 = vst [vmem:[%s1518_s5 + $0x30] ss:$-28 sps:$4 sm:$0xc1] %v830_v5   ;;  %v831_v10 = vrot.slane %v1126_v6, 2 }
 0x310   :  { %837 = vst [vmem:[%s1518_s5 + $0x28] ss:$-28 sps:$4 sm:$0xc1] %v829_v8  }
 0x311   :  { %839 = vst [vmem:[%s1518_s5 + $0x38] ss:$-28 sps:$4 sm:$0xc1] %v831_v10  }
 0x313   :  { %v1128_v11 = vpop.eup %1127 }
 0x314   :  { %v1130_v12 = vpop.eup %1129  ;;  %v962_v9 = vrot.slane %v1128_v11, 7 }
 0x315   :  { %v1132_v13 = vpop.eup %1131  ;;  %v964_v15 = vrot.slane %v1130_v12, 7 }
 0x316   :  { %v1134_v7 = vpop.eup %1133  ;;  %970 = vst [vmem:[%s1518_s5 + $0x20] sm:$0xe] %v962_v9  ;;  %v963_v14 = vrot.slane %v1132_v13, 7 }
 0x317   :  { %972 = vst [vmem:[%s1518_s5 + $0x30] sm:$0xe] %v964_v15  ;;  %v965_v17 = vrot.slane %v1134_v7, 7 }
 0x318   :  { %971 = vst [vmem:[%s1518_s5 + $0x28] sm:$0xe] %v963_v14 }
 0x319   :  { %973 = vst [vmem:[%s1518_s5 + $0x38] sm:$0xe] %v965_v17 }

</bundles_post_ra>
